<compile_context>
chip_gen: v6e
topology: v6e:2x2x1
jax: 0.10.0
libtpu: 0.0.40
codegen_flags: <defaults>
</compile_context>

<pallas_src>
import functools

import jax
import jax.numpy as jnp
from jax.experimental import pallas as pl
from jax.experimental.pallas import tpu as pltpu


def _ln(x, g, b, eps):
    mean = jnp.mean(x, axis=-1, keepdims=True)
    var = jnp.mean((x - mean) ** 2, axis=-1, keepdims=True)
    return (x - mean) * jax.lax.rsqrt(var + eps) * g + b


# ----------------------------- Pallas kernels ------------------------------ #

def _embed_kernel(patches_ref, pw_ref, tok_ref, g_ref, b_ref, o_ref, *, eps):
    """Patch matmul + (CLS + positional) bias + pre-LayerNorm, one aligned store.

    Rows are pre-padded to S_pad (multiple of 8); row 0 of `patches` is all-zero so
    `patch_emb + token_bias` yields the CLS row without any offset writes.
    """
    V, S_pad, K = patches_ref.shape
    D = pw_ref.shape[1]
    pe = jnp.dot(patches_ref[...].reshape(V * S_pad, K), pw_ref[...],
                 preferred_element_type=jnp.float32)
    x = pe.reshape(V, S_pad, D) + tok_ref[...][None]
    x = _ln(x.reshape(V * S_pad, D), g_ref[...], b_ref[...], eps)
    o_ref[...] = x.reshape(V, S_pad, D)


def _encoder_stack_kernel(x_ref, ln1g_ref, ln1b_ref, qkvw_ref, qkvb_ref,
                          ow_ref, ob_ref, ln2g_ref, ln2b_ref,
                          f1w_ref, f1b_ref, f2w_ref, f2b_ref,
                          out_ref, x_vmem, *, heads, eps, valid_s):
    """All encoder layers for one view-group + CLS gather + max-over-views pool.

    grid = (groups, layers). The residual stream stays resident in VMEM scratch across
    the "arbitrary" layer axis; per-layer weights are pipelined along that axis.
    """
    layer = pl.program_id(1)

    @pl.when(layer == 0)
    def _():
        x_vmem[...] = x_ref[...]

    V, S_pad, D = x_vmem.shape
    hd = D // heads
    M = V * S_pad
    x = x_vmem[...].reshape(M, D)

    # ---- attention block: LN1 -> fused QKV (scale folded into Q) -> SDPA -> out-proj ----
    h = _ln(x, ln1g_ref[...], ln1b_ref[...], eps)
    qkv = jnp.dot(h.astype(jnp.bfloat16), qkvw_ref[...],
                  preferred_element_type=jnp.float32) + qkvb_ref[...]
    q = qkv[:, 0 * D:1 * D].astype(jnp.bfloat16).reshape(V, S_pad, D)
    k = qkv[:, 1 * D:2 * D].astype(jnp.bfloat16).reshape(V, S_pad, D)
    v = qkv[:, 2 * D:3 * D].astype(jnp.bfloat16).reshape(V, S_pad, D)

    # Mask for padded key rows (token index >= valid_s); static decision at trace time.
    if valid_s < S_pad:
        kv_ids = jax.lax.broadcasted_iota(jnp.int32, (1, 1, S_pad), 2)
        kv_valid = kv_ids < valid_s
    else:
        kv_valid = None

    # Per-head attention; each head output is accumulated directly through its slice of
    # the output projection -> no lane-axis concatenate, only one (M, D) f32 accumulator.
    # TODO(synk): for real head counts switch to a head-batched contraction with 128-wide
    # kv tiles (flash-style) once the (V,S,h,d)->(V,h,S,d) relayout is tiled.
    acc = x + ob_ref[...]
    for hh in range(heads):
        sl = slice(hh * hd, (hh + 1) * hd)
        s = jnp.einsum('vqd,vkd->vqk', q[:, :, sl], k[:, :, sl],
                       preferred_element_type=jnp.float32)
        if kv_valid is not None:
            s = jnp.where(kv_valid, s, jnp.float32(-1e30))
        s = s - jnp.max(s, axis=-1, keepdims=True)
        p = jnp.exp(s)
        p = p / jnp.sum(p, axis=-1, keepdims=True)        # exact softmax (parity w/ torch)
        ho = jnp.einsum('vqk,vkd->vqd', p.astype(jnp.bfloat16), v[:, :, sl],
                        preferred_element_type=jnp.float32)
        acc = acc + jnp.dot(ho.reshape(M, hd).astype(jnp.bfloat16), ow_ref[sl, :],
                            preferred_element_type=jnp.float32)
    x = acc

    # ---- MLP block: LN2 -> fc1 + quick_gelu -> fc2 ----
    h = _ln(x, ln2g_ref[...], ln2b_ref[...], eps)
    h = jnp.dot(h.astype(jnp.bfloat16), f1w_ref[...],
                preferred_element_type=jnp.float32) + f1b_ref[...]
    h = h * jax.nn.sigmoid(1.702 * h)                     # quick_gelu
    h = jnp.dot(h.astype(jnp.bfloat16), f2w_ref[...],
                preferred_element_type=jnp.float32) + f2b_ref[...]
    x = x + h

    x_vmem[...] = x.reshape(V, S_pad, D)

    # CLS gather + max over the group's views. Cheap; written every step so the resident
    # output block always holds the latest value (last layer's write is what lands in HBM).
    cls = x.reshape(V, S_pad, D)[:, 0, :]                         # (V, D)
    out_ref[...] = jnp.max(cls, axis=0, keepdims=True)[None]     # (1, 1, D)


# ----------------------------- call wrappers -------------------------------- #

def clip_embed(patches_pad, patch_w, token_bias, pre_g, pre_b, cfg, views):
    N, S_pad, K = patches_pad.shape
    D = patch_w.shape[1]
    groups = N // views
    return pl.pallas_call(
        functools.partial(_embed_kernel, eps=cfg.eps),
        out_shape=jax.ShapeDtypeStruct((N, S_pad, D), jnp.float32),
        grid=(groups,),
        in_specs=[
            pl.BlockSpec((views, S_pad, K), lambda g: (g, 0, 0)),
            pl.BlockSpec((K, D), lambda g: (0, 0)),
            pl.BlockSpec((S_pad, D), lambda g: (0, 0)),
            pl.BlockSpec((1, D), lambda g: (0, 0)),
            pl.BlockSpec((1, D), lambda g: (0, 0)),
        ],
        out_specs=pl.BlockSpec((views, S_pad, D), lambda g: (g, 0, 0)),
        compiler_params=pltpu.CompilerParams(
            dimension_semantics=("parallel",),
            vmem_limit_bytes=32 * 1024 * 1024),
    )(patches_pad, patch_w, token_bias, pre_g, pre_b)


def clip_encoder_and_pool(x, stacked, cfg, views, valid_s):
    N, S_pad, D = x.shape
    groups = N // views
    L = cfg.layers
    F = cfg.mlp_dim

    def wspec(*shape):
        # Per-layer weight block: squeeze the stacked layer axis, index it by the layer
        # grid axis so the pipeline prefetches layer l+1 while layer l computes.
        return pl.BlockSpec((None,) + shape, lambda g, l: (l,) + (0,) * len(shape))

    return pl.pallas_call(
        functools.partial(_encoder_stack_kernel, heads=cfg.heads, eps=cfg.eps,
                          valid_s=valid_s),
        out_shape=jax.ShapeDtypeStruct((groups, 1, D), jnp.float32),
        grid=(groups, L),
        in_specs=[
            pl.BlockSpec((views, S_pad, D), lambda g, l: (g, 0, 0)),
            wspec(1, D), wspec(1, D),            # ln1
            wspec(D, 3 * D), wspec(1, 3 * D),    # fused qkv (scale folded into Q slice)
            wspec(D, D), wspec(1, D),            # out proj
            wspec(1, D), wspec(1, D),            # ln2
            wspec(D, F), wspec(1, F),            # fc1
            wspec(F, D), wspec(1, D),            # fc2
        ],
        out_specs=pl.BlockSpec((1, 1, D), lambda g, l: (g, 0, 0)),
        scratch_shapes=[pltpu.VMEM((views, S_pad, D), jnp.float32)],  # resident residual
        compiler_params=pltpu.CompilerParams(
            dimension_semantics=("parallel", "arbitrary"),
            vmem_limit_bytes=32 * 1024 * 1024),
    )(x, stacked["ln1_g"], stacked["ln1_b"], stacked["qkv_w"], stacked["qkv_b"],
      stacked["o_w"], stacked["o_b"], stacked["ln2_g"], stacked["ln2_b"],
      stacked["fc1_w"], stacked["fc1_b"], stacked["fc2_w"], stacked["fc2_b"])


# --------------------------- Model (CLIP-vision) ---------------------------- #

class Config:
    num_views = 4          # original default is 12; kept small here
    channels = 3
    image_size = 16
    patch_size = 8
    hidden = 128           # lane-dense (multiple of 128)
    heads = 4
    mlp_dim = 256
    layers = 2
    eps = 1e-5


def init_params(key, cfg):
    # TODO(synk): pretrained CLIPVisionModel weights are loaded from disk in the
    # reference; here params are randomly initialized with the same shapes.
    D, F, L = cfg.hidden, cfg.mlp_dim, cfg.layers
    P, C = cfg.patch_size, cfg.channels
    grid = cfg.image_size // P
    seq = 1 + grid * grid
    hd = D // cfg.heads
    scale = hd ** -0.5

    keys = jax.random.split(key, 3 + L)
    params = {
        # Conv2d(C, D, kernel=P, stride=P, bias=False) flattened to (C*P*P, D); bf16.
        "patch_w": (0.02 * jax.random.normal(keys[0], (C * P * P, D), jnp.float32)
                    ).astype(jnp.bfloat16),
        "class_emb": 0.02 * jax.random.normal(keys[1], (1, D), jnp.float32),
        "pos_emb": 0.02 * jax.random.normal(keys[2], (seq, D), jnp.float32),
        "pre_ln_g": jnp.ones((1, D), jnp.float32),
        "pre_ln_b": jnp.zeros((1, D), jnp.float32),
    }

    def dense(k, fi, fo):
        return (0.02 * jax.random.normal(k, (fi, fo), jnp.float32),
                jnp.zeros((1, fo), jnp.float32))

    names = ["ln1_g", "ln1_b", "qkv_w", "qkv_b", "o_w", "o_b",
             "ln2_g", "ln2_b", "fc1_w", "fc1_b", "fc2_w", "fc2_b"]
    per = {n: [] for n in names}
    for li in range(L):
        lk = jax.random.split(keys[3 + li], 6)
        qw, qb = dense(lk[0], D, D)
        kw, kb = dense(lk[1], D, D)
        vw, vb = dense(lk[2], D, D)
        ow, ob = dense(lk[3], D, D)
        f1w, f1b = dense(lk[4], D, F)
        f2w, f2b = dense(lk[5], F, D)
        per["ln1_g"].append(jnp.ones((1, D), jnp.float32))
        per["ln1_b"].append(jnp.zeros((1, D), jnp.float32))
        per["qkv_w"].append(jnp.concatenate([qw * scale, kw, vw], axis=1).astype(jnp.bfloat16))
        per["qkv_b"].append(jnp.concatenate([qb * scale, kb, vb], axis=1))
        per["o_w"].append(ow.astype(jnp.bfloat16))
        per["o_b"].append(ob)
        per["ln2_g"].append(jnp.ones((1, D), jnp.float32))
        per["ln2_b"].append(jnp.zeros((1, D), jnp.float32))
        per["fc1_w"].append(f1w.astype(jnp.bfloat16))
        per["fc1_b"].append(f1b)
        per["fc2_w"].append(f2w.astype(jnp.bfloat16))
        per["fc2_b"].append(f2b)
    params["layers"] = {n: jnp.stack(v, axis=0) for n, v in per.items()}
    return params


def mv_clip_forward(params, x, cfg):
    """Replicates MV_CLIP_without_adpter.forward: view/permute -> CLIP vision -> CLS max-pool."""
    N, C, H, W = x.shape
    V = cfg.num_views
    B = N // V
    P = cfg.patch_size
    gh, gw = H // P, W // P
    T = gh * gw
    S = T + 1
    S_pad = ((S + 7) // 8) * 8
    D = cfg.hidden

    # Faithful to the reference: view(B,V,C,H,W) -> permute(0,2,1,3,4) -> view(-1,C,H,W)
    # (this intentionally mixes the view and channel axes exactly like the PyTorch code).
    x = x.reshape(B, V, C, H, W)
    x = jnp.transpose(x, (0, 2, 1, 3, 4)).reshape(-1, C, H, W)

    # Non-overlapping PxP patches, channel-major inside a patch (matches the Conv2d
    # weight flattening used for patch_w). Pure JAX glue on small arrays.
    patches = x.reshape(N, C, gh, P, gw, P)
    patches = patches.transpose(0, 2, 4, 1, 3, 5).reshape(N, T, C * P * P)
    # Row 0 (CLS slot) and rows S..S_pad are zero patches; cast to bf16 in the wrapper
    # so the embed kernel's dominant input DMA is half-width.
    patches = jnp.pad(patches, ((0, 0), (1, S_pad - S), (0, 0))).astype(jnp.bfloat16)

    # Per-token additive bias: CLS embedding in row 0 + positional embedding, padded.
    token_bias = jnp.zeros((S_pad, D), jnp.float32)
    token_bias = token_bias.at[0].set(params["class_emb"][0])
    token_bias = token_bias.at[:S].add(params["pos_emb"])

    h = clip_embed(patches, params["patch_w"], token_bias,
                   params["pre_ln_g"], params["pre_ln_b"], cfg, V)       # (N, S_pad, D)
    pooled = clip_encoder_and_pool(h, params["layers"], cfg, V, S)        # (B, 1, D)
    return pooled


if __name__ == "__main__":
    cfg = Config()
    params = init_params(jax.random.PRNGKey(0), cfg)

    B_groups = 2
    N = B_groups * cfg.num_views                                          # 8 images total
    x = jax.random.normal(jax.random.PRNGKey(0),
                          (N, cfg.channels, cfg.image_size, cfg.image_size),
                          jnp.float32)

    fwd = jax.jit(functools.partial(mv_clip_forward, cfg=cfg))
    out = jax.block_until_ready(fwd(params, x))
    assert out.shape == (B_groups, 1, cfg.hidden), out.shape
    assert bool(jnp.all(jnp.isfinite(out)))
    print("KERNEL_OK")
</pallas_src>

<mosaic_0001>
module attributes {stable_mosaic.version = 11 : i64} {
  func.func @_embed_kernel(%arg0: i32, %arg1: memref<4x8x192xbf16, #tpu.memory_space<vmem>>, %arg2: memref<192x128xbf16, #tpu.memory_space<vmem>>, %arg3: memref<8x128xf32, #tpu.memory_space<vmem>>, %arg4: memref<1x128xf32, #tpu.memory_space<vmem>>, %arg5: memref<1x128xf32, #tpu.memory_space<vmem>>, %arg6: memref<4x8x128xf32, #tpu.memory_space<vmem>>) attributes {dimension_semantics = [#tpu.dimension_semantics<parallel>], iteration_bounds = array<i64: 2>, scalar_prefetch = 0 : i64, scratch_operands = 0 : i64, tpu.core_type = #tpu.core_type<tc>, window_params = [{transform_indices = @transform_0, window_bounds = array<i64: 4, 8, 192>}, {pipeline_mode = #tpu.pipeline_mode<synchronous>, transform_indices = @transform_1, window_bounds = array<i64: 192, 128>}, {pipeline_mode = #tpu.pipeline_mode<synchronous>, transform_indices = @transform_2, window_bounds = array<i64: 8, 128>}, {pipeline_mode = #tpu.pipeline_mode<synchronous>, transform_indices = @transform_3, window_bounds = array<i64: 1, 128>}, {pipeline_mode = #tpu.pipeline_mode<synchronous>, transform_indices = @transform_4, window_bounds = array<i64: 1, 128>}, {transform_indices = @transform_5, window_bounds = array<i64: 4, 8, 128>}]} {
    %c0 = arith.constant 0 : index
    %c0_0 = arith.constant 0 : index
    %c0_1 = arith.constant 0 : index
    %0 = vector.load %arg1[%c0, %c0_0, %c0_1] : memref<4x8x192xbf16, #tpu.memory_space<vmem>>, vector<4x8x192xbf16>
    %1 = vector.shape_cast %0 : vector<4x8x192xbf16> to vector<32x192xbf16>
    %c0_2 = arith.constant 0 : index
    %c0_3 = arith.constant 0 : index
    %2 = vector.load %arg2[%c0_2, %c0_3] : memref<192x128xbf16, #tpu.memory_space<vmem>>, vector<192x128xbf16>
    %cst = arith.constant dense<0.000000e+00> : vector<32x128xf32>
    %3 = tpu.matmul %1, %2, %cst {dimension_numbers = #tpu.dot_dimension_numbers<[1], [0], [0], [1], [0, 0, 1, 1], [], []>} : vector<32x192xbf16>, vector<192x128xbf16>, vector<32x128xf32> -> vector<32x128xf32>
    %4 = vector.shape_cast %3 : vector<32x128xf32> to vector<4x8x128xf32>
    %c0_4 = arith.constant 0 : index
    %c0_5 = arith.constant 0 : index
    %5 = vector.load %arg3[%c0_4, %c0_5] : memref<8x128xf32, #tpu.memory_space<vmem>>, vector<8x128xf32>
    %6 = vector.shape_cast %5 : vector<8x128xf32> to vector<1x8x128xf32>
    %7 = vector.broadcast %6 : vector<1x8x128xf32> to vector<4x8x128xf32>
    %8 = arith.addf %4, %7 : vector<4x8x128xf32>
    %9 = vector.shape_cast %8 : vector<4x8x128xf32> to vector<32x128xf32>
    %c0_6 = arith.constant 0 : index
    %c0_7 = arith.constant 0 : index
    %10 = vector.load %arg4[%c0_6, %c0_7] : memref<1x128xf32, #tpu.memory_space<vmem>>, vector<1x128xf32>
    %c0_8 = arith.constant 0 : index
    %c0_9 = arith.constant 0 : index
    %11 = vector.load %arg5[%c0_8, %c0_9] : memref<1x128xf32, #tpu.memory_space<vmem>>, vector<1x128xf32>
    %cst_10 = arith.constant dense<0.000000e+00> : vector<32xf32>
    %12 = vector.multi_reduction <add>, %9, %cst_10 [1] : vector<32x128xf32> to vector<32xf32>
    %13 = vector.shape_cast %12 : vector<32xf32> to vector<32x1xf32>
    %cst_11 = arith.constant 1.280000e+02 : f32
    %14 = vector.broadcast %cst_11 : f32 to vector<32x1xf32>
    %15 = arith.divf %13, %14 : vector<32x1xf32>
    %16 = vector.broadcast %15 : vector<32x1xf32> to vector<32x128xf32>
    %17 = arith.subf %9, %16 : vector<32x128xf32>
    %18 = arith.mulf %17, %17 : vector<32x128xf32>
    %cst_12 = arith.constant dense<0.000000e+00> : vector<32xf32>
    %19 = vector.multi_reduction <add>, %18, %cst_12 [1] : vector<32x128xf32> to vector<32xf32>
    %20 = vector.shape_cast %19 : vector<32xf32> to vector<32x1xf32>
    %cst_13 = arith.constant 1.280000e+02 : f32
    %21 = vector.broadcast %cst_13 : f32 to vector<32x1xf32>
    %22 = arith.divf %20, %21 : vector<32x1xf32>
    %23 = vector.broadcast %15 : vector<32x1xf32> to vector<32x128xf32>
    %24 = arith.subf %9, %23 : vector<32x128xf32>
    %cst_14 = arith.constant 9.99999974E-6 : f32
    %25 = vector.broadcast %cst_14 : f32 to vector<32x1xf32>
    %26 = arith.addf %22, %25 : vector<32x1xf32>
    %27 = math.rsqrt %26 : vector<32x1xf32>
    %28 = vector.broadcast %27 : vector<32x1xf32> to vector<32x128xf32>
    %29 = arith.mulf %24, %28 : vector<32x128xf32>
    %30 = vector.broadcast %10 : vector<1x128xf32> to vector<32x128xf32>
    %31 = arith.mulf %29, %30 : vector<32x128xf32>
    %32 = vector.broadcast %11 : vector<1x128xf32> to vector<32x128xf32>
    %33 = arith.addf %31, %32 : vector<32x128xf32>
    %34 = vector.shape_cast %33 : vector<32x128xf32> to vector<4x8x128xf32>
    %c0_15 = arith.constant 0 : index
    %c0_16 = arith.constant 0 : index
    %c0_17 = arith.constant 0 : index
    %35 = vector.load %arg6[%c0_15, %c0_16, %c0_17] : memref<4x8x128xf32, #tpu.memory_space<vmem>>, vector<4x8x128xf32>
    tpu.vector_store %arg6[%c0_15, %c0_16, %c0_17], %34 {strides = array<i32>} : memref<4x8x128xf32, #tpu.memory_space<vmem>>, vector<4x8x128xf32>,
    return
  }
  func.func @transform_0(%arg0: i32) -> (i32, i32, i32) {
    %c0_i32 = arith.constant 0 : i32
    %c0_i32_0 = arith.constant 0 : i32
    %c0_i32_1 = arith.constant 0 : i32
    return %arg0, %c0_i32, %c0_i32_0 : i32, i32, i32
  }
  func.func @transform_1(%arg0: i32) -> (i32, i32) {
    %c0_i32 = arith.constant 0 : i32
    %c0_i32_0 = arith.constant 0 : i32
    %c0_i32_1 = arith.constant 0 : i32
    return %c0_i32, %c0_i32_0 : i32, i32
  }
  func.func @transform_2(%arg0: i32) -> (i32, i32) {
    %c0_i32 = arith.constant 0 : i32
    %c0_i32_0 = arith.constant 0 : i32
    %c0_i32_1 = arith.constant 0 : i32
    return %c0_i32, %c0_i32_0 : i32, i32
  }
  func.func @transform_3(%arg0: i32) -> (i32, i32) {
    %c0_i32 = arith.constant 0 : i32
    %c0_i32_0 = arith.constant 0 : i32
    %c0_i32_1 = arith.constant 0 : i32
    return %c0_i32, %c0_i32_0 : i32, i32
  }
  func.func @transform_4(%arg0: i32) -> (i32, i32) {
    %c0_i32 = arith.constant 0 : i32
    %c0_i32_0 = arith.constant 0 : i32
    %c0_i32_1 = arith.constant 0 : i32
    return %c0_i32, %c0_i32_0 : i32, i32
  }
  func.func @transform_5(%arg0: i32) -> (i32, i32, i32) {
    %c0_i32 = arith.constant 0 : i32
    %c0_i32_0 = arith.constant 0 : i32
    %c0_i32_1 = arith.constant 0 : i32
    return %arg0, %c0_i32, %c0_i32_0 : i32, i32, i32
  }
}

module attributes {stable_mosaic.version = 11 : i64} {
  func.func @_encoder_stack_kernel(%arg0: i32, %arg1: i32, %arg2: memref<4x8x128xf32, #tpu.memory_space<vmem>>, %arg3: memref<1x1x128xf32, #tpu.memory_space<vmem>>, %arg4: memref<1x1x128xf32, #tpu.memory_space<vmem>>, %arg5: memref<1x128x384xbf16, #tpu.memory_space<vmem>>, %arg6: memref<1x1x384xf32, #tpu.memory_space<vmem>>, %arg7: memref<1x128x128xbf16, #tpu.memory_space<vmem>>, %arg8: memref<1x1x128xf32, #tpu.memory_space<vmem>>, %arg9: memref<1x1x128xf32, #tpu.memory_space<vmem>>, %arg10: memref<1x1x128xf32, #tpu.memory_space<vmem>>, %arg11: memref<1x128x256xbf16, #tpu.memory_space<vmem>>, %arg12: memref<1x1x256xf32, #tpu.memory_space<vmem>>, %arg13: memref<1x256x128xbf16, #tpu.memory_space<vmem>>, %arg14: memref<1x1x128xf32, #tpu.memory_space<vmem>>, %arg15: memref<1x1x128xf32, #tpu.memory_space<vmem>>, %arg16: memref<4x8x128xf32, #tpu.memory_space<vmem>>) attributes {dimension_semantics = [#tpu.dimension_semantics<parallel>, #tpu.dimension_semantics<arbitrary>], iteration_bounds = array<i64: 2, 2>, scalar_prefetch = 0 : i64, scratch_operands = 1 : i64, tpu.core_type = #tpu.core_type<tc>, window_params = [{transform_indices = @transform_0, window_bounds = array<i64: 4, 8, 128>}, {transform_indices = @transform_1, window_bounds = array<i64: 1, 1, 128>}, {transform_indices = @transform_2, window_bounds = array<i64: 1, 1, 128>}, {transform_indices = @transform_3, window_bounds = array<i64: 1, 128, 384>}, {transform_indices = @transform_4, window_bounds = array<i64: 1, 1, 384>}, {transform_indices = @transform_5, window_bounds = array<i64: 1, 128, 128>}, {transform_indices = @transform_6, window_bounds = array<i64: 1, 1, 128>}, {transform_indices = @transform_7, window_bounds = array<i64: 1, 1, 128>}, {transform_indices = @transform_8, window_bounds = array<i64: 1, 1, 128>}, {transform_indices = @transform_9, window_bounds = array<i64: 1, 128, 256>}, {transform_indices = @transform_10, window_bounds = array<i64: 1, 1, 256>}, {transform_indices = @transform_11, window_bounds = array<i64: 1, 256, 128>}, {transform_indices = @transform_12, window_bounds = array<i64: 1, 1, 128>}, {transform_indices = @transform_13, window_bounds = array<i64: 1, 1, 128>}]} {
    %c0_i32 = arith.constant 0 : i32
    %0 = arith.cmpi eq, %arg1, %c0_i32 : i32
    %1 = arith.extui %0 : i1 to i32
    %c0_i32_0 = arith.constant 0 : i32
    %2 = arith.cmpi ne, %1, %c0_i32_0 : i32
    scf.if %2 {
      %c0_90 = arith.constant 0 : index
      %c0_91 = arith.constant 0 : index
      %c0_92 = arith.constant 0 : index
      %215 = vector.load %arg2[%c0_90, %c0_91, %c0_92] : memref<4x8x128xf32, #tpu.memory_space<vmem>>, vector<4x8x128xf32>
      %c0_93 = arith.constant 0 : index
      %c0_94 = arith.constant 0 : index
      %c0_95 = arith.constant 0 : index
      %216 = vector.load %arg16[%c0_93, %c0_94, %c0_95] : memref<4x8x128xf32, #tpu.memory_space<vmem>>, vector<4x8x128xf32>
      tpu.vector_store %arg16[%c0_93, %c0_94, %c0_95], %215 {strides = array<i32>} : memref<4x8x128xf32, #tpu.memory_space<vmem>>, vector<4x8x128xf32>,
    } else {
    }
    %c0 = arith.constant 0 : index
    %c0_1 = arith.constant 0 : index
    %c0_2 = arith.constant 0 : index
    %3 = vector.load %arg16[%c0, %c0_1, %c0_2] : memref<4x8x128xf32, #tpu.memory_space<vmem>>, vector<4x8x128xf32>
    %4 = vector.shape_cast %3 : vector<4x8x128xf32> to vector<32x128xf32>
    %c0_3 = arith.constant 0 : index
    %c0_4 = arith.constant 0 : index
    %c0_5 = arith.constant 0 : index
    %5 = vector.load %arg3[%c0_3, %c0_4, %c0_5] : memref<1x1x128xf32, #tpu.memory_space<vmem>>, vector<1x1x128xf32>
    %6 = vector.shape_cast %5 : vector<1x1x128xf32> to vector<1x128xf32>
    %c0_6 = arith.constant 0 : index
    %c0_7 = arith.constant 0 : index
    %c0_8 = arith.constant 0 : index
    %7 = vector.load %arg4[%c0_6, %c0_7, %c0_8] : memref<1x1x128xf32, #tpu.memory_space<vmem>>, vector<1x1x128xf32>
    %8 = vector.shape_cast %7 : vector<1x1x128xf32> to vector<1x128xf32>
    %cst = arith.constant dense<0.000000e+00> : vector<32xf32>
    %9 = vector.multi_reduction <add>, %4, %cst [1] : vector<32x128xf32> to vector<32xf32>
    %10 = vector.shape_cast %9 : vector<32xf32> to vector<32x1xf32>
    %cst_9 = arith.constant 1.280000e+02 : f32
    %11 = vector.broadcast %cst_9 : f32 to vector<32x1xf32>
    %12 = arith.divf %10, %11 : vector<32x1xf32>
    %13 = vector.broadcast %12 : vector<32x1xf32> to vector<32x128xf32>
    %14 = arith.subf %4, %13 : vector<32x128xf32>
    %15 = arith.mulf %14, %14 : vector<32x128xf32>
    %cst_10 = arith.constant dense<0.000000e+00> : vector<32xf32>
    %16 = vector.multi_reduction <add>, %15, %cst_10 [1] : vector<32x128xf32> to vector<32xf32>
    %17 = vector.shape_cast %16 : vector<32xf32> to vector<32x1xf32>
    %cst_11 = arith.constant 1.280000e+02 : f32
    %18 = vector.broadcast %cst_11 : f32 to vector<32x1xf32>
    %19 = arith.divf %17, %18 : vector<32x1xf32>
    %20 = vector.broadcast %12 : vector<32x1xf32> to vector<32x128xf32>
    %21 = arith.subf %4, %20 : vector<32x128xf32>
    %cst_12 = arith.constant 9.99999974E-6 : f32
    %22 = vector.broadcast %cst_12 : f32 to vector<32x1xf32>
    %23 = arith.addf %19, %22 : vector<32x1xf32>
    %24 = math.rsqrt %23 : vector<32x1xf32>
    %25 = vector.broadcast %24 : vector<32x1xf32> to vector<32x128xf32>
    %26 = arith.mulf %21, %25 : vector<32x128xf32>
    %27 = vector.broadcast %6 : vector<1x128xf32> to vector<32x128xf32>
    %28 = arith.mulf %26, %27 : vector<32x128xf32>
    %29 = vector.broadcast %8 : vector<1x128xf32> to vector<32x128xf32>
    %30 = arith.addf %28, %29 : vector<32x128xf32>
    %31 = arith.truncf %30 : vector<32x128xf32> to vector<32x128xbf16>
    %c0_13 = arith.constant 0 : index
    %c0_14 = arith.constant 0 : index
    %c0_15 = arith.constant 0 : index
    %32 = vector.load %arg5[%c0_13, %c0_14, %c0_15] : memref<1x128x384xbf16, #tpu.memory_space<vmem>>, vector<1x128x384xbf16>
    %33 = vector.shape_cast %32 : vector<1x128x384xbf16> to vector<128x384xbf16>
    %cst_16 = arith.constant dense<0.000000e+00> : vector<32x384xf32>
    %34 = tpu.matmul %31, %33, %cst_16 {dimension_numbers = #tpu.dot_dimension_numbers<[1], [0], [0], [1], [0, 0, 1, 1], [], []>} : vector<32x128xbf16>, vector<128x384xbf16>, vector<32x384xf32> -> vector<32x384xf32>
    %c0_17 = arith.constant 0 : index
    %c0_18 = arith.constant 0 : index
    %c0_19 = arith.constant 0 : index
    %35 = vector.load %arg6[%c0_17, %c0_18, %c0_19] : memref<1x1x384xf32, #tpu.memory_space<vmem>>, vector<1x1x384xf32>
    %36 = vector.shape_cast %35 : vector<1x1x384xf32> to vector<1x384xf32>
    %37 = vector.broadcast %36 : vector<1x384xf32> to vector<32x384xf32>
    %38 = arith.addf %34, %37 : vector<32x384xf32>
    %39 = vector.extract_strided_slice %38 {offsets = [0, 0], sizes = [32, 128], strides = [1, 1]} : vector<32x384xf32> to vector<32x128xf32>
    %40 = arith.truncf %39 : vector<32x128xf32> to vector<32x128xbf16>
    %41 = vector.shape_cast %40 : vector<32x128xbf16> to vector<4x8x128xbf16>
    %42 = vector.extract_strided_slice %38 {offsets = [0, 128], sizes = [32, 128], strides = [1, 1]} : vector<32x384xf32> to vector<32x128xf32>
    %43 = arith.truncf %42 : vector<32x128xf32> to vector<32x128xbf16>
    %44 = vector.shape_cast %43 : vector<32x128xbf16> to vector<4x8x128xbf16>
    %45 = vector.extract_strided_slice %38 {offsets = [0, 256], sizes = [32, 128], strides = [1, 1]} : vector<32x384xf32> to vector<32x128xf32>
    %46 = arith.truncf %45 : vector<32x128xf32> to vector<32x128xbf16>
    %47 = vector.shape_cast %46 : vector<32x128xbf16> to vector<4x8x128xbf16>
    %48 = tpu.iota {dimensions = array<i32: 2>} : vector<1x1x8xi32>
    %c5_i32 = arith.constant 5 : i32
    %49 = vector.broadcast %c5_i32 : i32 to vector<1x1x8xi32>
    %50 = arith.cmpi slt, %48, %49 : vector<1x1x8xi32>
    %c0_20 = arith.constant 0 : index
    %c0_21 = arith.constant 0 : index
    %c0_22 = arith.constant 0 : index
    %51 = vector.load %arg8[%c0_20, %c0_21, %c0_22] : memref<1x1x128xf32, #tpu.memory_space<vmem>>, vector<1x1x128xf32>
    %52 = vector.shape_cast %51 : vector<1x1x128xf32> to vector<1x128xf32>
    %53 = vector.broadcast %52 : vector<1x128xf32> to vector<32x128xf32>
    %54 = arith.addf %4, %53 : vector<32x128xf32>
    %55 = vector.extract_strided_slice %41 {offsets = [0, 0, 0], sizes = [4, 8, 32], strides = [1, 1, 1]} : vector<4x8x128xbf16> to vector<4x8x32xbf16>
    %56 = vector.extract_strided_slice %44 {offsets = [0, 0, 0], sizes = [4, 8, 32], strides = [1, 1, 1]} : vector<4x8x128xbf16> to vector<4x8x32xbf16>
    "tpu.trace_start"() <{level = 10 : i32, message = "vqd,vkd->vqk"}> : () -> ()
    %cst_23 = arith.constant dense<0.000000e+00> : vector<4x8x8xf32>
    %57 = tpu.matmul %55, %56, %cst_23 {dimension_numbers = #tpu.dot_dimension_numbers<[2], [2], [1], [1], [0, 0, 0, 1, 1, 1], [0], [0]>} : vector<4x8x32xbf16>, vector<4x8x32xbf16>, vector<4x8x8xf32> -> vector<4x8x8xf32>
    %cst_24 = arith.constant -1.000000e+30 : f32
    "tpu.trace_stop"() : () -> ()
    %58 = vector.shape_cast %50 : vector<1x1x8xi1> to vector<1x1x8xi1>
    %59 = vector.broadcast %58 : vector<1x1x8xi1> to vector<4x8x8xi1>
    %60 = vector.broadcast %cst_24 : f32 to vector<4x8x8xf32>
    %61 = arith.select %59, %57, %60 : vector<4x8x8xi1>, vector<4x8x8xf32>
    %cst_25 = arith.constant dense<0xFF800000> : vector<4x8xf32>
    %62 = vector.multi_reduction <maximumf>, %61, %cst_25 [2] : vector<4x8x8xf32> to vector<4x8xf32>
    %63 = vector.shape_cast %62 : vector<4x8xf32> to vector<4x8x1xf32>
    %64 = vector.broadcast %63 : vector<4x8x1xf32> to vector<4x8x8xf32>
    %65 = arith.subf %61, %64 : vector<4x8x8xf32>
    %66 = math.exp %65 : vector<4x8x8xf32>
    %cst_26 = arith.constant dense<0.000000e+00> : vector<4x8xf32>
    %67 = vector.multi_reduction <add>, %66, %cst_26 [2] : vector<4x8x8xf32> to vector<4x8xf32>
    %68 = vector.shape_cast %67 : vector<4x8xf32> to vector<4x8x1xf32>
    %69 = vector.broadcast %68 : vector<4x8x1xf32> to vector<4x8x8xf32>
    %70 = arith.divf %66, %69 : vector<4x8x8xf32>
    %71 = arith.truncf %70 : vector<4x8x8xf32> to vector<4x8x8xbf16>
    %72 = vector.extract_strided_slice %47 {offsets = [0, 0, 0], sizes = [4, 8, 32], strides = [1, 1, 1]} : vector<4x8x128xbf16> to vector<4x8x32xbf16>
    "tpu.trace_start"() <{level = 10 : i32, message = "vqk,vkd->vqd"}> : () -> ()
    %cst_27 = arith.constant dense<0.000000e+00> : vector<4x8x32xf32>
    %73 = tpu.matmul %71, %72, %cst_27 {dimension_numbers = #tpu.dot_dimension_numbers<[2], [1], [1], [2], [0, 0, 0, 1, 1, 2], [0], [0]>} : vector<4x8x8xbf16>, vector<4x8x32xbf16>, vector<4x8x32xf32> -> vector<4x8x32xf32>
    "tpu.trace_stop"() : () -> ()
    %74 = vector.shape_cast %73 : vector<4x8x32xf32> to vector<32x32xf32>
    %75 = arith.truncf %74 : vector<32x32xf32> to vector<32x32xbf16>
    %c0_28 = arith.constant 0 : index
    %c0_29 = arith.constant 0 : index
    %c0_30 = arith.constant 0 : index
    %76 = vector.load %arg7[%c0_28, %c0_29, %c0_30] : memref<1x128x128xbf16, #tpu.memory_space<vmem>>, vector<1x32x128xbf16>
    %77 = vector.shape_cast %76 : vector<1x32x128xbf16> to vector<32x128xbf16>
    %cst_31 = arith.constant dense<0.000000e+00> : vector<32x128xf32>
    %78 = tpu.matmul %75, %77, %cst_31 {dimension_numbers = #tpu.dot_dimension_numbers<[1], [0], [0], [1], [0, 0, 1, 1], [], []>} : vector<32x32xbf16>, vector<32x128xbf16>, vector<32x128xf32> -> vector<32x128xf32>
    %79 = arith.addf %54, %78 : vector<32x128xf32>
    %80 = vector.extract_strided_slice %41 {offsets = [0, 0, 32], sizes = [4, 8, 32], strides = [1, 1, 1]} : vector<4x8x128xbf16> to vector<4x8x32xbf16>
    %81 = vector.extract_strided_slice %44 {offsets = [0, 0, 32], sizes = [4, 8, 32], strides = [1, 1, 1]} : vector<4x8x128xbf16> to vector<4x8x32xbf16>
    "tpu.trace_start"() <{level = 10 : i32, message = "vqd,vkd->vqk"}> : () -> ()
    %cst_32 = arith.constant dense<0.000000e+00> : vector<4x8x8xf32>
    %82 = tpu.matmul %80, %81, %cst_32 {dimension_numbers = #tpu.dot_dimension_numbers<[2], [2], [1], [1], [0, 0, 0, 1, 1, 1], [0], [0]>} : vector<4x8x32xbf16>, vector<4x8x32xbf16>, vector<4x8x8xf32> -> vector<4x8x8xf32>
    %cst_33 = arith.constant -1.000000e+30 : f32
    "tpu.trace_stop"() : () -> ()
    %83 = vector.shape_cast %50 : vector<1x1x8xi1> to vector<1x1x8xi1>
    %84 = vector.broadcast %83 : vector<1x1x8xi1> to vector<4x8x8xi1>
    %85 = vector.broadcast %cst_33 : f32 to vector<4x8x8xf32>
    %86 = arith.select %84, %82, %85 : vector<4x8x8xi1>, vector<4x8x8xf32>
    %cst_34 = arith.constant dense<0xFF800000> : vector<4x8xf32>
    %87 = vector.multi_reduction <maximumf>, %86, %cst_34 [2] : vector<4x8x8xf32> to vector<4x8xf32>
    %88 = vector.shape_cast %87 : vector<4x8xf32> to vector<4x8x1xf32>
    %89 = vector.broadcast %88 : vector<4x8x1xf32> to vector<4x8x8xf32>
    %90 = arith.subf %86, %89 : vector<4x8x8xf32>
    %91 = math.exp %90 : vector<4x8x8xf32>
    %cst_35 = arith.constant dense<0.000000e+00> : vector<4x8xf32>
    %92 = vector.multi_reduction <add>, %91, %cst_35 [2] : vector<4x8x8xf32> to vector<4x8xf32>
    %93 = vector.shape_cast %92 : vector<4x8xf32> to vector<4x8x1xf32>
    %94 = vector.broadcast %93 : vector<4x8x1xf32> to vector<4x8x8xf32>
    %95 = arith.divf %91, %94 : vector<4x8x8xf32>
    %96 = arith.truncf %95 : vector<4x8x8xf32> to vector<4x8x8xbf16>
    %97 = vector.extract_strided_slice %47 {offsets = [0, 0, 32], sizes = [4, 8, 32], strides = [1, 1, 1]} : vector<4x8x128xbf16> to vector<4x8x32xbf16>
    "tpu.trace_start"() <{level = 10 : i32, message = "vqk,vkd->vqd"}> : () -> ()
    %cst_36 = arith.constant dense<0.000000e+00> : vector<4x8x32xf32>
    %98 = tpu.matmul %96, %97, %cst_36 {dimension_numbers = #tpu.dot_dimension_numbers<[2], [1], [1], [2], [0, 0, 0, 1, 1, 2], [0], [0]>} : vector<4x8x8xbf16>, vector<4x8x32xbf16>, vector<4x8x32xf32> -> vector<4x8x32xf32>
    "tpu.trace_stop"() : () -> ()
    %99 = vector.shape_cast %98 : vector<4x8x32xf32> to vector<32x32xf32>
    %100 = arith.truncf %99 : vector<32x32xf32> to vector<32x32xbf16>
    %c0_37 = arith.constant 0 : index
    %c32 = arith.constant 32 : index
    %c0_38 = arith.constant 0 : index
    %101 = vector.load %arg7[%c0_37, %c32, %c0_38] : memref<1x128x128xbf16, #tpu.memory_space<vmem>>, vector<1x32x128xbf16>
    %102 = vector.shape_cast %101 : vector<1x32x128xbf16> to vector<32x128xbf16>
    %cst_39 = arith.constant dense<0.000000e+00> : vector<32x128xf32>
    %103 = tpu.matmul %100, %102, %cst_39 {dimension_numbers = #tpu.dot_dimension_numbers<[1], [0], [0], [1], [0, 0, 1, 1], [], []>} : vector<32x32xbf16>, vector<32x128xbf16>, vector<32x128xf32> -> vector<32x128xf32>
    %104 = arith.addf %79, %103 : vector<32x128xf32>
    %105 = vector.extract_strided_slice %41 {offsets = [0, 0, 64], sizes = [4, 8, 32], strides = [1, 1, 1]} : vector<4x8x128xbf16> to vector<4x8x32xbf16>
    %106 = vector.extract_strided_slice %44 {offsets = [0, 0, 64], sizes = [4, 8, 32], strides = [1, 1, 1]} : vector<4x8x128xbf16> to vector<4x8x32xbf16>
    "tpu.trace_start"() <{level = 10 : i32, message = "vqd,vkd->vqk"}> : () -> ()
    %cst_40 = arith.constant dense<0.000000e+00> : vector<4x8x8xf32>
    %107 = tpu.matmul %105, %106, %cst_40 {dimension_numbers = #tpu.dot_dimension_numbers<[2], [2], [1], [1], [0, 0, 0, 1, 1, 1], [0], [0]>} : vector<4x8x32xbf16>, vector<4x8x32xbf16>, vector<4x8x8xf32> -> vector<4x8x8xf32>
    %cst_41 = arith.constant -1.000000e+30 : f32
    "tpu.trace_stop"() : () -> ()
    %108 = vector.shape_cast %50 : vector<1x1x8xi1> to vector<1x1x8xi1>
    %109 = vector.broadcast %108 : vector<1x1x8xi1> to vector<4x8x8xi1>
    %110 = vector.broadcast %cst_41 : f32 to vector<4x8x8xf32>
    %111 = arith.select %109, %107, %110 : vector<4x8x8xi1>, vector<4x8x8xf32>
    %cst_42 = arith.constant dense<0xFF800000> : vector<4x8xf32>
    %112 = vector.multi_reduction <maximumf>, %111, %cst_42 [2] : vector<4x8x8xf32> to vector<4x8xf32>
    %113 = vector.shape_cast %112 : vector<4x8xf32> to vector<4x8x1xf32>
    %114 = vector.broadcast %113 : vector<4x8x1xf32> to vector<4x8x8xf32>
    %115 = arith.subf %111, %114 : vector<4x8x8xf32>
    %116 = math.exp %115 : vector<4x8x8xf32>
    %cst_43 = arith.constant dense<0.000000e+00> : vector<4x8xf32>
    %117 = vector.multi_reduction <add>, %116, %cst_43 [2] : vector<4x8x8xf32> to vector<4x8xf32>
    %118 = vector.shape_cast %117 : vector<4x8xf32> to vector<4x8x1xf32>
    %119 = vector.broadcast %118 : vector<4x8x1xf32> to vector<4x8x8xf32>
    %120 = arith.divf %116, %119 : vector<4x8x8xf32>
    %121 = arith.truncf %120 : vector<4x8x8xf32> to vector<4x8x8xbf16>
    %122 = vector.extract_strided_slice %47 {offsets = [0, 0, 64], sizes = [4, 8, 32], strides = [1, 1, 1]} : vector<4x8x128xbf16> to vector<4x8x32xbf16>
    "tpu.trace_start"() <{level = 10 : i32, message = "vqk,vkd->vqd"}> : () -> ()
    %cst_44 = arith.constant dense<0.000000e+00> : vector<4x8x32xf32>
    %123 = tpu.matmul %121, %122, %cst_44 {dimension_numbers = #tpu.dot_dimension_numbers<[2], [1], [1], [2], [0, 0, 0, 1, 1, 2], [0], [0]>} : vector<4x8x8xbf16>, vector<4x8x32xbf16>, vector<4x8x32xf32> -> vector<4x8x32xf32>
    "tpu.trace_stop"() : () -> ()
    %124 = vector.shape_cast %123 : vector<4x8x32xf32> to vector<32x32xf32>
    %125 = arith.truncf %124 : vector<32x32xf32> to vector<32x32xbf16>
    %c0_45 = arith.constant 0 : index
    %c64 = arith.constant 64 : index
    %c0_46 = arith.constant 0 : index
    %126 = vector.load %arg7[%c0_45, %c64, %c0_46] : memref<1x128x128xbf16, #tpu.memory_space<vmem>>, vector<1x32x128xbf16>
    %127 = vector.shape_cast %126 : vector<1x32x128xbf16> to vector<32x128xbf16>
    %cst_47 = arith.constant dense<0.000000e+00> : vector<32x128xf32>
    %128 = tpu.matmul %125, %127, %cst_47 {dimension_numbers = #tpu.dot_dimension_numbers<[1], [0], [0], [1], [0, 0, 1, 1], [], []>} : vector<32x32xbf16>, vector<32x128xbf16>, vector<32x128xf32> -> vector<32x128xf32>
    %129 = arith.addf %104, %128 : vector<32x128xf32>
    %130 = vector.extract_strided_slice %41 {offsets = [0, 0, 96], sizes = [4, 8, 32], strides = [1, 1, 1]} : vector<4x8x128xbf16> to vector<4x8x32xbf16>
    %131 = vector.extract_strided_slice %44 {offsets = [0, 0, 96], sizes = [4, 8, 32], strides = [1, 1, 1]} : vector<4x8x128xbf16> to vector<4x8x32xbf16>
    "tpu.trace_start"() <{level = 10 : i32, message = "vqd,vkd->vqk"}> : () -> ()
    %cst_48 = arith.constant dense<0.000000e+00> : vector<4x8x8xf32>
    %132 = tpu.matmul %130, %131, %cst_48 {dimension_numbers = #tpu.dot_dimension_numbers<[2], [2], [1], [1], [0, 0, 0, 1, 1, 1], [0], [0]>} : vector<4x8x32xbf16>, vector<4x8x32xbf16>, vector<4x8x8xf32> -> vector<4x8x8xf32>
    %cst_49 = arith.constant -1.000000e+30 : f32
    "tpu.trace_stop"() : () -> ()
    %133 = vector.shape_cast %50 : vector<1x1x8xi1> to vector<1x1x8xi1>
    %134 = vector.broadcast %133 : vector<1x1x8xi1> to vector<4x8x8xi1>
    %135 = vector.broadcast %cst_49 : f32 to vector<4x8x8xf32>
    %136 = arith.select %134, %132, %135 : vector<4x8x8xi1>, vector<4x8x8xf32>
    %cst_50 = arith.constant dense<0xFF800000> : vector<4x8xf32>
    %137 = vector.multi_reduction <maximumf>, %136, %cst_50 [2] : vector<4x8x8xf32> to vector<4x8xf32>
    %138 = vector.shape_cast %137 : vector<4x8xf32> to vector<4x8x1xf32>
    %139 = vector.broadcast %138 : vector<4x8x1xf32> to vector<4x8x8xf32>
    %140 = arith.subf %136, %139 : vector<4x8x8xf32>
    %141 = math.exp %140 : vector<4x8x8xf32>
    %cst_51 = arith.constant dense<0.000000e+00> : vector<4x8xf32>
    %142 = vector.multi_reduction <add>, %141, %cst_51 [2] : vector<4x8x8xf32> to vector<4x8xf32>
    %143 = vector.shape_cast %142 : vector<4x8xf32> to vector<4x8x1xf32>
    %144 = vector.broadcast %143 : vector<4x8x1xf32> to vector<4x8x8xf32>
    %145 = arith.divf %141, %144 : vector<4x8x8xf32>
    %146 = arith.truncf %145 : vector<4x8x8xf32> to vector<4x8x8xbf16>
    %147 = vector.extract_strided_slice %47 {offsets = [0, 0, 96], sizes = [4, 8, 32], strides = [1, 1, 1]} : vector<4x8x128xbf16> to vector<4x8x32xbf16>
    "tpu.trace_start"() <{level = 10 : i32, message = "vqk,vkd->vqd"}> : () -> ()
    %cst_52 = arith.constant dense<0.000000e+00> : vector<4x8x32xf32>
    %148 = tpu.matmul %146, %147, %cst_52 {dimension_numbers = #tpu.dot_dimension_numbers<[2], [1], [1], [2], [0, 0, 0, 1, 1, 2], [0], [0]>} : vector<4x8x8xbf16>, vector<4x8x32xbf16>, vector<4x8x32xf32> -> vector<4x8x32xf32>
    "tpu.trace_stop"() : () -> ()
    %149 = vector.shape_cast %148 : vector<4x8x32xf32> to vector<32x32xf32>
    %150 = arith.truncf %149 : vector<32x32xf32> to vector<32x32xbf16>
    %c0_53 = arith.constant 0 : index
    %c96 = arith.constant 96 : index
    %c0_54 = arith.constant 0 : index
    %151 = vector.load %arg7[%c0_53, %c96, %c0_54] : memref<1x128x128xbf16, #tpu.memory_space<vmem>>, vector<1x32x128xbf16>
    %152 = vector.shape_cast %151 : vector<1x32x128xbf16> to vector<32x128xbf16>
    %cst_55 = arith.constant dense<0.000000e+00> : vector<32x128xf32>
    %153 = tpu.matmul %150, %152, %cst_55 {dimension_numbers = #tpu.dot_dimension_numbers<[1], [0], [0], [1], [0, 0, 1, 1], [], []>} : vector<32x32xbf16>, vector<32x128xbf16>, vector<32x128xf32> -> vector<32x128xf32>
    %154 = arith.addf %129, %153 : vector<32x128xf32>
    %c0_56 = arith.constant 0 : index
    %c0_57 = arith.constant 0 : index
    %c0_58 = arith.constant 0 : index
    %155 = vector.load %arg9[%c0_56, %c0_57, %c0_58] : memref<1x1x128xf32, #tpu.memory_space<vmem>>, vector<1x1x128xf32>
    %156 = vector.shape_cast %155 : vector<1x1x128xf32> to vector<1x128xf32>
    %c0_59 = arith.constant 0 : index
    %c0_60 = arith.constant 0 : index
    %c0_61 = arith.constant 0 : index
    %157 = vector.load %arg10[%c0_59, %c0_60, %c0_61] : memref<1x1x128xf32, #tpu.memory_space<vmem>>, vector<1x1x128xf32>
    %158 = vector.shape_cast %157 : vector<1x1x128xf32> to vector<1x128xf32>
    %cst_62 = arith.constant dense<0.000000e+00> : vector<32xf32>
    %159 = vector.multi_reduction <add>, %154, %cst_62 [1] : vector<32x128xf32> to vector<32xf32>
    %160 = vector.shape_cast %159 : vector<32xf32> to vector<32x1xf32>
    %cst_63 = arith.constant 1.280000e+02 : f32
    %161 = vector.broadcast %cst_63 : f32 to vector<32x1xf32>
    %162 = arith.divf %160, %161 : vector<32x1xf32>
    %163 = vector.broadcast %162 : vector<32x1xf32> to vector<32x128xf32>
    %164 = arith.subf %154, %163 : vector<32x128xf32>
    %165 = arith.mulf %164, %164 : vector<32x128xf32>
    %cst_64 = arith.constant dense<0.000000e+00> : vector<32xf32>
    %166 = vector.multi_reduction <add>, %165, %cst_64 [1] : vector<32x128xf32> to vector<32xf32>
    %167 = vector.shape_cast %166 : vector<32xf32> to vector<32x1xf32>
    %cst_65 = arith.constant 1.280000e+02 : f32
    %168 = vector.broadcast %cst_65 : f32 to vector<32x1xf32>
    %169 = arith.divf %167, %168 : vector<32x1xf32>
    %170 = vector.broadcast %162 : vector<32x1xf32> to vector<32x128xf32>
    %171 = arith.subf %154, %170 : vector<32x128xf32>
    %cst_66 = arith.constant 9.99999974E-6 : f32
    %172 = vector.broadcast %cst_66 : f32 to vector<32x1xf32>
    %173 = arith.addf %169, %172 : vector<32x1xf32>
    %174 = math.rsqrt %173 : vector<32x1xf32>
    %175 = vector.broadcast %174 : vector<32x1xf32> to vector<32x128xf32>
    %176 = arith.mulf %171, %175 : vector<32x128xf32>
    %177 = vector.broadcast %156 : vector<1x128xf32> to vector<32x128xf32>
    %178 = arith.mulf %176, %177 : vector<32x128xf32>
    %179 = vector.broadcast %158 : vector<1x128xf32> to vector<32x128xf32>
    %180 = arith.addf %178, %179 : vector<32x128xf32>
    %181 = arith.truncf %180 : vector<32x128xf32> to vector<32x128xbf16>
    %c0_67 = arith.constant 0 : index
    %c0_68 = arith.constant 0 : index
    %c0_69 = arith.constant 0 : index
    %182 = vector.load %arg11[%c0_67, %c0_68, %c0_69] : memref<1x128x256xbf16, #tpu.memory_space<vmem>>, vector<1x128x256xbf16>
    %183 = vector.shape_cast %182 : vector<1x128x256xbf16> to vector<128x256xbf16>
    %cst_70 = arith.constant dense<0.000000e+00> : vector<32x256xf32>
    %184 = tpu.matmul %181, %183, %cst_70 {dimension_numbers = #tpu.dot_dimension_numbers<[1], [0], [0], [1], [0, 0, 1, 1], [], []>} : vector<32x128xbf16>, vector<128x256xbf16>, vector<32x256xf32> -> vector<32x256xf32>
    %c0_71 = arith.constant 0 : index
    %c0_72 = arith.constant 0 : index
    %c0_73 = arith.constant 0 : index
    %185 = vector.load %arg12[%c0_71, %c0_72, %c0_73] : memref<1x1x256xf32, #tpu.memory_space<vmem>>, vector<1x1x256xf32>
    %186 = vector.shape_cast %185 : vector<1x1x256xf32> to vector<1x256xf32>
    %187 = vector.broadcast %186 : vector<1x256xf32> to vector<32x256xf32>
    %188 = arith.addf %184, %187 : vector<32x256xf32>
    %cst_74 = arith.constant 1.702000e+00 : f32
    %189 = vector.broadcast %cst_74 : f32 to vector<32x256xf32>
    %190 = arith.mulf %189, %188 : vector<32x256xf32>
    %191 = arith.negf %190 : vector<32x256xf32>
    %192 = math.exp %191 : vector<32x256xf32>
    %cst_75 = arith.constant 1.000000e+00 : f32
    %193 = vector.broadcast %cst_75 : f32 to vector<32x256xf32>
    %194 = arith.addf %193, %192 : vector<32x256xf32>
    %195 = arith.divf %193, %194 : vector<32x256xf32>
    %196 = arith.mulf %188, %195 : vector<32x256xf32>
    %197 = arith.truncf %196 : vector<32x256xf32> to vector<32x256xbf16>
    %c0_76 = arith.constant 0 : index
    %c0_77 = arith.constant 0 : index
    %c0_78 = arith.constant 0 : index
    %198 = vector.load %arg13[%c0_76, %c0_77, %c0_78] : memref<1x256x128xbf16, #tpu.memory_space<vmem>>, vector<1x256x128xbf16>
    %199 = vector.shape_cast %198 : vector<1x256x128xbf16> to vector<256x128xbf16>
    %cst_79 = arith.constant dense<0.000000e+00> : vector<32x128xf32>
    %200 = tpu.matmul %197, %199, %cst_79 {dimension_numbers = #tpu.dot_dimension_numbers<[1], [0], [0], [1], [0, 0, 1, 1], [], []>} : vector<32x256xbf16>, vector<256x128xbf16>, vector<32x128xf32> -> vector<32x128xf32>
    %c0_80 = arith.constant 0 : index
    %c0_81 = arith.constant 0 : index
    %c0_82 = arith.constant 0 : index
    %201 = vector.load %arg14[%c0_80, %c0_81, %c0_82] : memref<1x1x128xf32, #tpu.memory_space<vmem>>, vector<1x1x128xf32>
    %202 = vector.shape_cast %201 : vector<1x1x128xf32> to vector<1x128xf32>
    %203 = vector.broadcast %202 : vector<1x128xf32> to vector<32x128xf32>
    %204 = arith.addf %200, %203 : vector<32x128xf32>
    %205 = arith.addf %154, %204 : vector<32x128xf32>
    %206 = vector.shape_cast %205 : vector<32x128xf32> to vector<4x8x128xf32>
    %c0_83 = arith.constant 0 : index
    %c0_84 = arith.constant 0 : index
    %c0_85 = arith.constant 0 : index
    %207 = vector.load %arg16[%c0_83, %c0_84, %c0_85] : memref<4x8x128xf32, #tpu.memory_space<vmem>>, vector<4x8x128xf32>
    tpu.vector_store %arg16[%c0_83, %c0_84, %c0_85], %206 {strides = array<i32>} : memref<4x8x128xf32, #tpu.memory_space<vmem>>, vector<4x8x128xf32>,
    %208 = vector.shape_cast %205 : vector<32x128xf32> to vector<4x8x128xf32>
    %209 = vector.extract_strided_slice %208 {offsets = [0, 0, 0], sizes = [4, 1, 128], strides = [1, 1, 1]} : vector<4x8x128xf32> to vector<4x1x128xf32>
    %210 = vector.shape_cast %209 : vector<4x1x128xf32> to vector<4x128xf32>
    %cst_86 = arith.constant dense<0xFF800000> : vector<128xf32>
    %211 = vector.multi_reduction <maximumf>, %210, %cst_86 [0] : vector<4x128xf32> to vector<128xf32>
    %212 = vector.shape_cast %211 : vector<128xf32> to vector<1x128xf32>
    %213 = vector.shape_cast %212 : vector<1x128xf32> to vector<1x1x128xf32>
    %c0_87 = arith.constant 0 : index
    %c0_88 = arith.constant 0 : index
    %c0_89 = arith.constant 0 : index
    %214 = vector.load %arg15[%c0_87, %c0_88, %c0_89] : memref<1x1x128xf32, #tpu.memory_space<vmem>>, vector<1x1x128xf32>
    tpu.vector_store %arg15[%c0_87, %c0_88, %c0_89], %213 {strides = array<i32>} : memref<1x1x128xf32, #tpu.memory_space<vmem>>, vector<1x1x128xf32>,
    return
  }
  func.func @transform_0(%arg0: i32, %arg1: i32) -> (i32, i32, i32) {
    %c0_i32 = arith.constant 0 : i32
    %c0_i32_0 = arith.constant 0 : i32
    %c0_i32_1 = arith.constant 0 : i32
    return %arg0, %c0_i32, %c0_i32_0 : i32, i32, i32
  }
  func.func @transform_1(%arg0: i32, %arg1: i32) -> (i32, i32, i32) {
    %c0_i32 = arith.constant 0 : i32
    %c0_i32_0 = arith.constant 0 : i32
    %c0_i32_1 = arith.constant 0 : i32
    return %arg1, %c0_i32, %c0_i32_0 : i32, i32, i32
  }
  func.func @transform_2(%arg0: i32, %arg1: i32) -> (i32, i32, i32) {
    %c0_i32 = arith.constant 0 : i32
    %c0_i32_0 = arith.constant 0 : i32
    %c0_i32_1 = arith.constant 0 : i32
    return %arg1, %c0_i32, %c0_i32_0 : i32, i32, i32
  }
  func.func @transform_3(%arg0: i32, %arg1: i32) -> (i32, i32, i32) {
    %c0_i32 = arith.constant 0 : i32
    %c0_i32_0 = arith.constant 0 : i32
    %c0_i32_1 = arith.constant 0 : i32
    return %arg1, %c0_i32, %c0_i32_0 : i32, i32, i32
  }
  func.func @transform_4(%arg0: i32, %arg1: i32) -> (i32, i32, i32) {
    %c0_i32 = arith.constant 0 : i32
    %c0_i32_0 = arith.constant 0 : i32
    %c0_i32_1 = arith.constant 0 : i32
    return %arg1, %c0_i32, %c0_i32_0 : i32, i32, i32
  }
  func.func @transform_5(%arg0: i32, %arg1: i32) -> (i32, i32, i32) {
    %c0_i32 = arith.constant 0 : i32
    %c0_i32_0 = arith.constant 0 : i32
    %c0_i32_1 = arith.constant 0 : i32
    return %arg1, %c0_i32, %c0_i32_0 : i32, i32, i32
  }
  func.func @transform_6(%arg0: i32, %arg1: i32) -> (i32, i32, i32) {
    %c0_i32 = arith.constant 0 : i32
    %c0_i32_0 = arith.constant 0 : i32
    %c0_i32_1 = arith.constant 0 : i32
    return %arg1, %c0_i32, %c0_i32_0 : i32, i32, i32
  }
  func.func @transform_7(%arg0: i32, %arg1: i32) -> (i32, i32, i32) {
    %c0_i32 = arith.constant 0 : i32
    %c0_i32_0 = arith.constant 0 : i32
    %c0_i32_1 = arith.constant 0 : i32
    return %arg1, %c0_i32, %c0_i32_0 : i32, i32, i32
  }
  func.func @transform_8(%arg0: i32, %arg1: i32) -> (i32, i32, i32) {
    %c0_i32 = arith.constant 0 : i32
    %c0_i32_0 = arith.constant 0 : i32
    %c0_i32_1 = arith.constant 0 : i32
    return %arg1, %c0_i32, %c0_i32_0 : i32, i32, i32
  }
  func.func @transform_9(%arg0: i32, %arg1: i32) -> (i32, i32, i32) {
    %c0_i32 = arith.constant 0 : i32
    %c0_i32_0 = arith.constant 0 : i32
    %c0_i32_1 = arith.constant 0 : i32
    return %arg1, %c0_i32, %c0_i32_0 : i32, i32, i32
  }
  func.func @transform_10(%arg0: i32, %arg1: i32) -> (i32, i32, i32) {
    %c0_i32 = arith.constant 0 : i32
    %c0_i32_0 = arith.constant 0 : i32
    %c0_i32_1 = arith.constant 0 : i32
    return %arg1, %c0_i32, %c0_i32_0 : i32, i32, i32
  }
  func.func @transform_11(%arg0: i32, %arg1: i32) -> (i32, i32, i32) {
    %c0_i32 = arith.constant 0 : i32
    %c0_i32_0 = arith.constant 0 : i32
    %c0_i32_1 = arith.constant 0 : i32
    return %arg1, %c0_i32, %c0_i32_0 : i32, i32, i32
  }
  func.func @transform_12(%arg0: i32, %arg1: i32) -> (i32, i32, i32) {
    %c0_i32 = arith.constant 0 : i32
    %c0_i32_0 = arith.constant 0 : i32
    %c0_i32_1 = arith.constant 0 : i32
    return %arg1, %c0_i32, %c0_i32_0 : i32, i32, i32
  }
  func.func @transform_13(%arg0: i32, %arg1: i32) -> (i32, i32, i32) {
    %c0_i32 = arith.constant 0 : i32
    %c0_i32_0 = arith.constant 0 : i32
    %c0_i32_1 = arith.constant 0 : i32
    return %arg0, %c0_i32, %c0_i32_0 : i32, i32, i32
  }
}

</mosaic_0001>

<bundles_post_ra>
// kernel: mv_clip_forward.2
= control target key start
LH: loop header
LB: loop body
LE: loop exit
PB: predicated region body
PF: predicated region fallthrough
CT: control target
= control target key end

     0   :  { %s669_s18 = smov 0   ;;  %s768_s0 = inlined_call_operand.vmem [shape: bf16[8,8,192], index: 0, kind: input, shape index: {}]   ;;  %s769_s1 = inlined_call_operand.vmem [shape: bf16[192,128], index: 1, kind: input, shape index: {}]   ;;  %s770_s2 = inlined_call_operand.vmem [shape: f32[8,128], index: 2, kind: input, shape index: {}]   ;;  %s771_s3 = inlined_call_operand.vmem [shape: f32[1,128], index: 3, kind: input, shape index: {}]   ;;  %s772_s4 = inlined_call_operand.vmem [shape: f32[1,128], index: 4, kind: input, shape index: {}]   ;;  %s773_s5 = inlined_call_operand.vmem [shape: f32[8,8,128], index: 5, kind: output, shape index: {}]  }
   0x1 LB: > { %s538_s19 = sadd.s32 4294967295, %s636_s18   ;;  %p542_p0 = scmp.ge.s32.totalorder %s636_s18, 1  ;;  %s636_s18 = sphi %s669_s18, %s15_s18  }
   0x2   : > { %p189_p1 = scmp.lt.s32.totalorder %s636_s18, 3 }
   0x4   : > { %p190_p2 = pnand %p542_p0, %p189_p1 }
   0x5   : > { %s543_s22 = sshll.u32 (!%p190_p2), %s538_s19, 2 }
   0x6   : > { %193 = sbr.rel (%p190_p2) target bundleno = 570 (0x23a), region = 40  ;;  %p219_p3 = scmp.lt.s32.totalorder (!%p190_p2), %s543_s22, 7 }
   0xb   : > { %v604_v0 = vld [vmem:[%s769_s1 + $0x38] sm:$0xff]   ;;  %v638_v1 = vmov 0   ;;  %v605_v2 = vld [vmem:[%s769_s1 + $0x30] sm:$0xff]   ;;  %s775_s22 = smov (!%p219_p3, %s543_s22), 7  ;;  %v606_v3 = vld [vmem:[%s769_s1 + $0x28] sm:$0xff]   ;;  %vm350_vm0 = vcmask 523264  }
   0xc   : > { %357 = vmatprep.subr.bf16.mxu0 %v638_v1  ;;  %571 = vmatprep.subr.bf16.mxu1 %v638_v1  ;;  %s570_s27 = sshll.u32 %s775_s22, 3  ;;  %v607_v4 = vld [vmem:[%s769_s1 + $0x20] sm:$0xff]   ;;  %v608_v6 = vld [vmem:[%s769_s1 + $0x18] sm:$0xff]   ;;  %v609_v8 = vld [vmem:[%s769_s1 + $0x10] sm:$0xff]  }
   0xd   : > { %358 = vmatpush1.bf16.msra.mxu0 %v604_v0  ;;  %583 = vmatpush1.bf16.msra.mxu1 %v604_v0  ;;  %s703_s7 = scalar_lea.vmem %s768_s0, %s570_s27  ;;  %v610_v9 = vld [vmem:[%s769_s1 + $0x8] sm:$0xff]   ;;  %v611_v10 = vld [vmem:[%s769_s1] sm:$0xff]   ;;  %v612_v11 = vld [vmem:[%s769_s1 + $0x58] sm:$0xff]   ;;  %s229_s10 = scalar_lea.vmem %s773_s5, %s570_s27 }
   0xe   : > { %359 = vmatprep.subr.bf16.mxu0 %v638_v1  ;;  %572 = vmatprep.subr.bf16.mxu1 %v638_v1  ;;  %v618_v5 = vld [vmem:[%s703_s7 + $0x4] ss:$8 sps:$4 sm:$0xff]   ;;  %v621_v7 = vld [vmem:[%s703_s7 + $0x14] ss:$8 sps:$4 sm:$0xff]   ;;  %v616_v15 = vld [vmem:[%s703_s7] ss:$8 sps:$4 sm:$0xff]  }
   0xf   : > { %564 = vmatprep.mubr.msk.bf16.mxu0 %vm350_vm0, %v618_v5  ;;  %565 = vmatprep.mubr.msk.bf16.mxu1 %vm350_vm0, %v621_v7  ;;  %v613_v12 = vld [vmem:[%s769_s1 + $0x50] sm:$0xff]   ;;  %v614_v13 = vld [vmem:[%s769_s1 + $0x48] sm:$0xff]   ;;  %v615_v14 = vld [vmem:[%s769_s1 + $0x40] sm:$0xff]  }
  0x10   : > { %v619_v16 = vld [vmem:[%s703_s7 + $0x10] ss:$8 sps:$4 sm:$0xff]   ;;  %v406_v17 = vld [vmem:[%s770_s2] sm:$0xff] }
  0x11   : > { %360 = vmatpush1.bf16.msra.mxu0 %v605_v2  ;;  %584 = vmatpush1.bf16.msra.mxu1 %v605_v2  ;;  %v566_v59 = vld [vmem:[%s771_s3] ss:$0 sm:$0xff] }
  0x12   : > { %361 = vmatprep.subr.bf16.mxu0 %v638_v1  ;;  %573 = vmatprep.subr.bf16.mxu1 %v638_v1  ;;  %v567_v61 = vld [vmem:[%s772_s4] ss:$0 sm:$0xff] }
  0x15   : > { %362 = vmatpush1.bf16.msra.mxu0 %v606_v3  ;;  %585 = vmatpush1.bf16.msra.mxu1 %v606_v3 }
  0x16   : > { %363 = vmatprep.subr.bf16.mxu0 %v638_v1  ;;  %574 = vmatprep.subr.bf16.mxu1 %v638_v1 }
  0x19   : > { %364 = vmatpush1.bf16.msra.mxu0 %v607_v4  ;;  %586 = vmatpush1.bf16.msra.mxu1 %v607_v4 }
  0x1a   : > { %365 = vmatprep.subr.bf16.mxu0 %v638_v1  ;;  %575 = vmatprep.subr.bf16.mxu1 %v638_v1 }
  0x1d   : > { %366 = vmatpush1.bf16.msra.mxu0 %v608_v6  ;;  %587 = vmatpush1.bf16.msra.mxu1 %v608_v6 }
  0x1e   : > { %367 = vmatprep.subr.bf16.mxu0 %v638_v1  ;;  %576 = vmatprep.subr.bf16.mxu1 %v638_v1 }
  0x21   : > { %368 = vmatpush1.bf16.msra.mxu0 %v609_v8  ;;  %588 = vmatpush1.bf16.msra.mxu1 %v609_v8 }
  0x22   : > { %369 = vmatprep.subr.bf16.mxu0 %v638_v1  ;;  %577 = vmatprep.subr.bf16.mxu1 %v638_v1 }
  0x25   : > { %370 = vmatpush1.bf16.msra.mxu0 %v610_v9  ;;  %589 = vmatpush1.bf16.msra.mxu1 %v610_v9 }
  0x26   : > { %371 = vmatprep.subr.bf16.mxu0 %v638_v1  ;;  %578 = vmatprep.subr.bf16.mxu1 %v638_v1 }
  0x29   : > { %372 = vmatpush1.bf16.msra.mxu0 %v611_v10  ;;  %590 = vmatpush1.bf16.msra.mxu1 %v611_v10 }
  0x2a   : > { %381 = vmatprep.subr.bf16.mxu0 %v638_v1  ;;  %579 = vmatprep.subr.bf16.mxu1 %v638_v1 }
  0x2d   : > { %382 = vmatpush2.bf16.msra.mxu0 %v612_v11  ;;  %591 = vmatpush2.bf16.msra.mxu1 %v612_v11 }
  0x2e   : > { %383 = vmatprep.subr.bf16.mxu0 %v638_v1  ;;  %580 = vmatprep.subr.bf16.mxu1 %v638_v1 }
  0x31   : > { %384 = vmatpush2.bf16.msra.mxu0 %v613_v12  ;;  %592 = vmatpush2.bf16.msra.mxu1 %v613_v12 }
  0x32   : > { %385 = vmatprep.subr.bf16.mxu0 %v638_v1  ;;  %581 = vmatprep.subr.bf16.mxu1 %v638_v1 }
  0x35   : > { %386 = vmatpush2.bf16.msra.mxu0 %v614_v13  ;;  %593 = vmatpush2.bf16.msra.mxu1 %v614_v13 }
  0x36   : > { %387 = vmatprep.subr.bf16.mxu0 %v638_v1  ;;  %582 = vmatprep.subr.bf16.mxu1 %v638_v1 }
  0x39   : > { %388 = vmatpush2.bf16.msra.mxu0 %v615_v14  ;;  %594 = vmatpush2.bf16.msra.mxu1 %v615_v14 }
  0x3c   : > { %390 = vmatmul.mubr.bf16.vlgmr.msra.gmra.mxu0 %v616_v15  ;;  %398 = vmatmul.mubr.bf16.vlgmr.msra.gmra.mxu1 %v619_v16 }
  0xfc   : > { %v391_v18 = vpop.f32.mrf.mxu0  ;;  %v399_v19 = vpop.f32.mrf.mxu1 }
  0xfd   : > { %v407_v20 = vadd.f32 %v406_v17, %v391_v18  ;;  %v409_v21 = vadd.f32 %v406_v17, %v399_v19 }
  0xfe   : > { %v393_v22 = vpop.f32.mrf.mxu0  ;;  %v401_v23 = vpop.f32.mrf.mxu1 }
  0xff   : > { %417 = vadd.xlane.f32.xlu1 %v409_v21  ;;  %413 = vadd.xlane.f32.xlu0 %v407_v20 }
 0x100   : > { %v394_v24 = vpop.f32.mrf.mxu0  ;;  %v402_v25 = vpop.f32.mrf.mxu1 }
 0x101   : > { %v408_v26 = vadd.f32 %v406_v17, %v394_v24  ;;  %v410_v27 = vadd.f32 %v406_v17, %v402_v25 }
 0x102   : > { %v396_v28 = vpop.f32.mrf.mxu0  ;;  %v404_v29 = vpop.f32.mrf.mxu1 }
 0x103   : > { %419 = vadd.xlane.f32.xlu1 %v410_v27  ;;  %415 = vadd.xlane.f32.xlu0 %v408_v26 }
 0x188   : > { %v418_v30 = vpop.xlane.xlu1 %417  ;;  %v414_v31 = vpop.xlane.xlu0 %413 }
 0x189   : > { %v424_v32 = vmul.f32 0.0078125, %v418_v30  ;;  %v422_v33 = vmul.f32 0.0078125, %v414_v31 }
 0x18b   : > { %v426_v34 = vsub.f32 %v407_v20, %v422_v33  ;;  %v428_v37 = vsub.f32 %v409_v21, %v424_v32 }
 0x18c   : > { %v420_v35 = vpop.xlane.xlu1 %419  ;;  %v416_v36 = vpop.xlane.xlu0 %415 }
 0x18d   : > { %v425_v38 = vmul.f32 0.0078125, %v420_v35  ;;  %v423_v39 = vmul.f32 0.0078125, %v416_v36  ;;  %v430_v40 = vmul.f32 %v426_v34, %v426_v34  ;;  %v432_v43 = vmul.f32 %v428_v37, %v428_v37 }
 0x18f   : > { %v427_v41 = vsub.f32 %v408_v26, %v423_v39  ;;  %434 = vadd.xlane.f32.xlu0 %v430_v40  ;;  %v429_v42 = vsub.f32 %v410_v27, %v425_v38 }
 0x191   : > { %v431_v44 = vmul.f32 %v427_v41, %v427_v41  ;;  %v433_v45 = vmul.f32 %v429_v42, %v429_v42 }
 0x193   : > { %438 = vadd.xlane.f32.xlu0 %v432_v43  ;;  %436 = vadd.xlane.f32.xlu1 %v431_v44 }
 0x197   : > { %440 = vadd.xlane.f32.xlu1 %v433_v45 }
 0x218   : > { %v435_v46 = vpop.xlane.xlu0 %434 }
 0x219   : > { %v442_v47 = vmul.f32 0.0078125, %v435_v46 }
 0x21b   : > { %v446_v48 = vadd.f32 1e-05, %v442_v47 }
 0x21c   : > { %v437_v49 = vpop.xlane.xlu1 %436  ;;  %v439_v50 = vpop.xlane.xlu0 %438 }
 0x21d   : > { %622 = vrsqrt.f32 %v446_v48  ;;  %v443_v51 = vmul.f32 0.0078125, %v437_v49  ;;  %v444_v52 = vmul.f32 0.0078125, %v439_v50 }
 0x21f   : > { %v447_v53 = vadd.f32 1e-05, %v443_v51  ;;  %v448_v54 = vadd.f32 1e-05, %v444_v52 }
 0x220   : > { %v441_v55 = vpop.xlane.xlu1 %440 }
 0x221   : > { %624 = vrsqrt.f32 %v447_v53  ;;  %v445_v56 = vmul.f32 0.0078125, %v441_v55 }
 0x222   : > { %626 = vrsqrt.f32 %v448_v54 }
 0x223   : > { %v449_v57 = vadd.f32 1e-05, %v445_v56 }
 0x225   : > { %628 = vrsqrt.f32 %v449_v57 }
 0x22a   : > { %v623_v58 = vpop.eup %622 }
 0x22b   : > { %v454_v60 = vmul.f32 %v623_v58, %v426_v34 }
 0x22d   : > { %v464_v62 = vmul.f32 %v566_v59, %v454_v60 }
 0x22e   : > { %v625_v63 = vpop.eup %624 }
 0x22f   : > { %v627_v0 = vpop.eup %626  ;;  %v474_v1 = vadd.f32 %v567_v61, %v464_v62  ;;  %v455_v2 = vmul.f32 %v625_v63, %v427_v41 }
 0x230   : > { %v456_v3 = vmul.f32 %v627_v0, %v428_v37 }
 0x231   : > { %478 = vst [vmem:[%s229_s10] sm:$0xff] %v474_v1  ;;  %v465_v4 = vmul.f32 %v566_v59, %v455_v2 }
 0x232   : > { %v629_v5 = vpop.eup %628  ;;  %v466_v6 = vmul.f32 %v566_v59, %v456_v3 }
 0x233   : > { %v475_v7 = vadd.f32 %v567_v61, %v465_v4  ;;  %v457_v8 = vmul.f32 %v629_v5, %v429_v42 }
 0x234   : > { %v476_v9 = vadd.f32 %v567_v61, %v466_v6 }
 0x235   : > { %479 = vst [vmem:[%s229_s10 + $0x8] sm:$0xff] %v475_v7  ;;  %v467_v10 = vmul.f32 %v566_v59, %v457_v8 }
 0x236   : > { %480 = vst [vmem:[%s229_s10 + $0x10] sm:$0xff] %v476_v9 }
 0x237   : > { %v477_v11 = vadd.f32 %v567_v61, %v467_v10 }
 0x239   : > { %481 = vst [vmem:[%s229_s10 + $0x18] sm:$0xff] %v477_v11 }
 0x23a PF: > { %s15_s18 = sadd.s32 1, %s636_s18  }
 0x23b   : > { %p12_p4 = scmp.ge.s32.totalorder %s15_s18, 4  }
 0x23d   :  { %14 = sbr.rel (!%p12_p4) target bundleno = 1 (0x1), region = 70 }

// kernel: mv_clip_forward.3
= control target key start
LH: loop header
LB: loop body
LE: loop exit
PB: predicated region body
PF: predicated region fallthrough
CT: control target
= control target key end

     0   :  { %s5559_s0 = inlined_call_operand.vmem [shape: f32[8,8,128], index: 0, kind: input, shape index: {}]   ;;  %s5560_s1 = inlined_call_operand.vmem [shape: f32[2,1,128], index: 1, kind: input, shape index: {}]   ;;  %s5561_s2 = inlined_call_operand.vmem [shape: f32[2,1,128], index: 2, kind: input, shape index: {}]   ;;  %s5562_s3 = inlined_call_operand.vmem [shape: bf16[2,128,384], index: 3, kind: input, shape index: {}]   ;;  %s5563_s4 = inlined_call_operand.vmem [shape: f32[2,1,384], index: 4, kind: input, shape index: {}]   ;;  %s5564_s5 = inlined_call_operand.vmem [shape: bf16[2,128,128], index: 5, kind: input, shape index: {}]   ;;  %s5565_s6 = inlined_call_operand.vmem [shape: f32[2,1,128], index: 6, kind: input, shape index: {}]   ;;  %s5566_s7 = inlined_call_operand.vmem [shape: f32[2,1,128], index: 7, kind: input, shape index: {}]   ;;  %s5567_s8 = inlined_call_operand.vmem [shape: f32[2,1,128], index: 8, kind: input, shape index: {}]   ;;  %s5568_s9 = inlined_call_operand.vmem [shape: bf16[2,128,256], index: 9, kind: input, shape index: {}]   ;;  %s5569_s10 = inlined_call_operand.vmem [shape: f32[2,1,256], index: 10, kind: input, shape index: {}]   ;;  %s5570_s11 = inlined_call_operand.vmem [shape: bf16[2,256,128], index: 11, kind: input, shape index: {}]   ;;  %s5571_s12 = inlined_call_operand.vmem [shape: f32[2,1,128], index: 12, kind: input, shape index: {}]   ;;  %s5572_s13 = inlined_call_operand.hbm [shape: f32[2,1,128], index: 13, kind: output, shape index: {}]  }
   0x1   :  { %5586 = sst [smem:[#allocation18_spill]] %s5559_s0 }
   0x2   :  { %5587 = sst [smem:[#allocation19_spill]] %s5561_s2 }
   0x3   :  { %5588 = sst [smem:[#allocation20_spill]] %s5562_s3 }
   0x4   :  { %5589 = sst [smem:[#allocation21_spill]] %s5564_s5 }
   0x5   :  { %5590 = sst [smem:[#allocation22_spill]] %s5572_s13 }
   0x6   :  { %18 = vsyncpa [#allocation4], 0 }
   0x7   :  { %20 = vsyncpa [#allocation4 + $0x1], 0  ;;  %s4805_s25 = smov 0   ;;  %s4807_s26 = smov 0  }
   0x8   :  { %s4809_s27 = smov 0   ;;  %s4811_s28 = smov 0  }
   0x9   :  { %s4813_s29 = smov 0   ;;  %s4815_s30 = smov 0  }
   0xa   :  { %s4817_s14 = smov 0   ;;  %s4819_s15 = smov 0  }
   0xb LB: > { %5591 = sst [smem:[#allocation6_spill]] %s4698_s25  ;;  %s3833_s16 = sadd.s32 4294967295, %s4726_s15   ;;  %s4726_s15 = sphi %s4819_s15, %s26_s15   ;;  %s4722_s14 = sphi %s4817_s14, %s5630_s14   ;;  %s4718_s30 = sphi %s4815_s30, %s5629_s30   ;;  %s4714_s29 = sphi %s4813_s29, %s5628_s29   ;;  %s4710_s28 = sphi %s4811_s28, %s5627_s28   ;;  %s4706_s27 = sphi %s4809_s27, %s5626_s27   ;;  %s4702_s26 = sphi %s4807_s26, %s5632_s26   ;;  %s4698_s25 = sphi %s4805_s25, %s5631_s25  }
   0xc   : > { %5592 = sst [smem:[#allocation7_spill]] %s4706_s27  ;;  %s3834_s17 = sadd.s32 4294967294, %s4726_s15  }
   0xd   : > { %5593 = sst [smem:[#allocation8_spill]] %s4710_s28  ;;  %s35_s18 = sadd.s32 1, %s4718_s30 }
   0xe   : > { %5594 = sst [smem:[#allocation9_spill]] %s4714_s29  ;;  %p36_p0 = scmp.ge.s32.totalorder %s35_s18, 2 }
   0xf   : > { %5595 = sst [smem:[#allocation10_spill]] %s4718_s30  ;;  %s38_s19 = sadd.s32 1, %s4722_s14 }
  0x10   : > { %5596 = sst [smem:[#allocation11_spill]] %s4722_s14  ;;  %p393_p1 = scmp.ne.s32.totalorder %s4706_s27, %s4702_s26 }
  0x11   : > { %5597 = sst [smem:[#allocation12_spill]] %s4726_s15  ;;  %p394_p2 = scmp.eq.s32.totalorder %s3833_s16, 3 }
  0x12   : > { %s5634_s18 = smov (%p36_p0, %s35_s18), 0  ;;  %s5636_s19 = smov (!%p36_p0, %s38_s19), %s4722_s14 }
  0x13   : > { %5598 = sst [smem:[#allocation13_spill]] %s5634_s18  ;;  %p4854_p3 = por %p394_p2, %p393_p1 }
  0x14   : > { %p399_p4 = scmp.ne.s32.totalorder %s4702_s26, %s4698_s25  ;;  %p40_p5 = scmp.ge.s32.totalorder %s5636_s19, 2 }
  0x15   : > { %s5599_s20 = scalar_select %p4854_p3, 1, 0 }
  0x16   : > { %p400_p6 = scmp.eq.s32.totalorder %s3834_s17, 3  ;;  %p3837_p7 = scmp.ge.s32.totalorder %s4726_s15, 1 }
  0x17   : > { %5600 = sst [smem:[#allocation14_spill]] %s5599_s20  ;;  %p509_p8 = scmp.lt.s32.totalorder %s4726_s15, 5 }
  0x18   : > { %s5638_s19 = smov (%p40_p5, %s5636_s19), 0  ;;  %p4864_p9 = por %p400_p6, %p399_p4 }
  0x19   : > { %5601 = sst [smem:[#allocation15_spill]] %s5638_s19  ;;  %p510_p10 = pnand %p3837_p7, %p509_p8 }
  0x1a   : > { %s5602_s21 = scalar_select %p4864_p9, 1, 0 }
  0x1b   : > { %s380_s22 = ssub.s32 %s4722_s14, %s5638_s19  ;;  %s383_s23 = sadd.s32 1, %s4706_s27 }
  0x1c   : > { %5603 = sst [smem:[#allocation16_spill]] %s5602_s21  ;;  %p381_p11 = scmp.eq.s32.totalorder %s380_s22, 0 }
  0x1d   : > { %513 = sbr.rel (%p510_p10) target bundleno = 4437 (0x1155), region = 72  ;;  %s3838_s17 = sshll.u32 (!%p510_p10), %s4714_s29, 2 }
  0x1e   : > { %s4872_s24 = scalar_select %p381_p11, %s4706_s27, %s383_s23  }
  0x1f   : > { %p599_p12 = scmp.lt.s32.totalorder (!%p510_p10), %s3838_s17, 7  ;;  %p604_p13 = scmp.lt.s32.totalorder (!%p510_p10), %s4710_s28, 1 }
  0x20   : > { %5604 = sst [smem:[#allocation17_spill]] %s4872_s24 }
  0x21   : > { %s5605_s0 = sld [smem:[#allocation18_spill]] (!%p510_p10) }
  0x22   : > { %s5640_s17 = smov (!%p599_p12, %s3838_s17), 7  ;;  %s5607_s3 = sld [smem:[#allocation20_spill]] }
  0x23   : > { %s4878_s18 = scalar_select %p604_p13, %s4710_s28, 1 }
  0x24   : > { %s3839_s22 = sshll.u32 %s5640_s17, 3  ;;  %s5608_s5 = sld [smem:[#allocation21_spill]] }
  0x25   : > { %s4359_s15 = smul.u32 192, %s4878_s18  ;;  %s3982_s20 = sshll.u32 %s4878_s18, 6 }
  0x26   : > { %s4360_s13 = smul.u32 3, %s4878_s18  ;;  %s3983_s19 = sshll.u32 %s4878_s18, 7 }
  0x27   : > { %s602_s16 = scalar_lea.vmem %s5605_s0, %s3839_s22  ;;  %s4926_s30 = scalar_lea.vmem %s5568_s9, %s3983_s19 }
  0x28   : > { %s4897_s17 = scalar_lea.vmem %s5607_s3, %s4359_s15  ;;  %s4907_s27 = scalar_lea.vmem %s5563_s4, %s4360_s13 }
  0x29   : > { %s4936_s0 = scalar_lea.vmem %s5570_s11, %s3983_s19  ;;  %s649_s15 = scalar_lea.vmem %s5571_s12, %s4878_s18 }
  0x2a   : > { %s4902_s23 = scalar_lea.vmem %s5608_s5, %s3982_s20  ;;  %s3845_s20 = sshll.u32 %s4878_s18, 1 }
  0x2b   : > { %s4931_s25 = scalar_lea.vmem %s5569_s10, %s3845_s20  ;;  %s5609_s3 = sand.u32 1, %s4702_s26  }
  0x2c   : > { %s4944_s28 = scalar_lea.vmem [#allocation3], %s5609_s3  ;;  %s5610_s5 = sld [smem:[#allocation8_spill]] }
  0x32   : > { %p3848_p0 = scmp.ne.s32.totalorder %s5610_s5, 0 }
  0x34   : > { %654 = sbr.rel (%p3848_p0) target bundleno = 60 (0x3c), region = 76 }
  0x39   : > { %v655_v0 = vld [vmem:[%s602_s16] sm:$0xff]  ;;  %v656_v1 = vld [vmem:[%s602_s16 + $0x8] sm:$0xff]  ;;  %v657_v2 = vld [vmem:[%s602_s16 + $0x10] sm:$0xff] }
  0x3a   : > { %659 = vst [vmem:[#allocation2 + $0x10] sm:$0xff] %v655_v0  ;;  %660 = vst [vmem:[#allocation2] sm:$0xff] %v656_v1  ;;  %v658_v3 = vld [vmem:[%s602_s16 + $0x18] sm:$0xff] }
  0x3b   : > { %661 = vst [vmem:[#allocation2 + $0x18] sm:$0xff] %v657_v2  ;;  %662 = vst [vmem:[#allocation2 + $0x8] sm:$0xff] %v658_v3 }
  0x3c PF: > { %v4438_v8 = vld [vmem:[%s4897_s17 + $0xac] ss:$12 sps:$4 sm:$0xff]   ;;  %v4440_v9 = vld [vmem:[%s4897_s17 + $0xa8] ss:$12 sps:$4 sm:$0xff]   ;;  %v4443_v27 = vld [vmem:[%s4897_s17 + $0xb0] ss:$12 sps:$4 sm:$0xff]   ;;  %s5611_s16 = scalar_lea.vmem %s5560_s1, %s4878_s18  ;;  %s5614_s2 = scalar_lea.vmem %s5565_s6, %s4878_s18 }
  0x3d   : > { %913 = vmatprep.subr.bf16.mxu0 %v4438_v8  ;;  %v4441_v26 = vld [vmem:[%s4897_s17 + $0x94] ss:$12 sps:$4 sm:$0xff]   ;;  %v4444_v28 = vld [vmem:[%s4897_s17 + $0x90] ss:$12 sps:$4 sm:$0xff]   ;;  %4115 = vmatprep.subr.bf16.mxu1 %v4443_v27  ;;  %v4447_v30 = vld [vmem:[%s4897_s17 + $0x98] ss:$12 sps:$4 sm:$0xff]   ;;  %s5615_s5 = scalar_lea.vmem %s5566_s7, %s4878_s18 }
  0x3e   : > { %914 = vmatpush1.bf16.msra.mxu0 %v4440_v9  ;;  %4116 = vmatpush3.bf16.msra.mxu1 %v4443_v27  ;;  %v4445_v29 = vld [vmem:[%s4897_s17 + $0x7c] ss:$12 sps:$4 sm:$0xff]   ;;  %v4448_v31 = vld [vmem:[%s4897_s17 + $0x78] ss:$12 sps:$4 sm:$0xff]   ;;  %v4451_v33 = vld [vmem:[%s4897_s17 + $0x80] ss:$12 sps:$4 sm:$0xff]  }
  0x3f   : > { %915 = vmatprep.subr.bf16.mxu0 %v4441_v26  ;;  %4117 = vmatprep.subr.bf16.mxu1 %v4447_v30  ;;  %v4449_v32 = vld [vmem:[%s4897_s17 + $0x64] ss:$12 sps:$4 sm:$0xff]   ;;  %v4452_v34 = vld [vmem:[%s4897_s17 + $0x60] ss:$12 sps:$4 sm:$0xff]   ;;  %v4455_v36 = vld [vmem:[%s4897_s17 + $0x68] ss:$12 sps:$4 sm:$0xff]  }
  0x40   : > { %v4453_v35 = vld [vmem:[%s4897_s17 + $0x4c] ss:$12 sps:$4 sm:$0xff]   ;;  %v4456_v37 = vld [vmem:[%s4897_s17 + $0x48] ss:$12 sps:$4 sm:$0xff]   ;;  %v4459_v39 = vld [vmem:[%s4897_s17 + $0x50] ss:$12 sps:$4 sm:$0xff]  }
  0x41   : > { %v663_v4 = vld [vmem:[#allocation2 + $0x10] sm:$0xff]  ;;  %v664_v6 = vld [vmem:[#allocation2] sm:$0xff]  ;;  %v4461_v41 = vld [vmem:[%s4897_s17 + $0x1c] ss:$12 sps:$4 sm:$0xff]   ;;  %v4728_v43 = vmov 0   ;;  %s5612_s20 = sld [smem:[#allocation19_spill]] }
  0x42   : > { %v665_v5 = vld [vmem:[#allocation2 + $0x18] sm:$0xff]  ;;  %669 = vadd.xlane.f32.xlu0 %v663_v4  ;;  %v666_v7 = vld [vmem:[#allocation2 + $0x8] sm:$0xff]  ;;  %916 = vmatpush1.bf16.msra.mxu0 %v4444_v28  ;;  %v4457_v38 = vld [vmem:[%s4897_s17 + $0x34] ss:$12 sps:$4 sm:$0xff]   ;;  %vm4730_vm0 = vmmov 0   ;;  %vm1065_vm1 = vcmask 261120  }
  0x43   : > { %673 = vadd.xlane.f32.xlu1 %v665_v5  ;;  %917 = vmatprep.subr.bf16.mxu0 %v4445_v29  ;;  %v4460_v40 = vld [vmem:[%s4897_s17 + $0x30] ss:$12 sps:$4 sm:$0xff]   ;;  %v4463_v42 = vld [vmem:[%s4897_s17 + $0x38] ss:$12 sps:$4 sm:$0xff]   ;;  %v4467_v46 = vld [vmem:[%s4897_s17 + $0x20] ss:$12 sps:$4 sm:$0xff]  }
  0x44   : > { %4118 = vmatpush3.bf16.msra.mxu1 %v4447_v30  ;;  %945 = vmatprep.mubr.bf16.mxu0 %v4728_v43  ;;  %v4464_v44 = vld [vmem:[%s4897_s17 + $0x18] ss:$12 sps:$4 sm:$0xff]   ;;  %v4468_v47 = vld [vmem:[%s4897_s17] ss:$12 sps:$4 sm:$0xff]   ;;  %v4469_v48 = vld [vmem:[%s4897_s17 + $0x8] ss:$12 sps:$4 sm:$0xff]  }
  0x45   : > { %4119 = vmatprep.subr.bf16.mxu1 %v4451_v33  ;;  %v4465_v45 = vld [vmem:[%s4897_s17 + $0x4] ss:$12 sps:$4 sm:$0xff]   ;;  %v3849_v63 = vld [vmem:[%s5611_s16] ss:$0 sm:$0xff]  ;;  %vm1308_vm2 = vcmask 1043456   ;;  %vm1256_vm4 = vcmask 64512   ;;  %s5616_s16 = scalar_lea.vmem %s5567_s8, %s4878_s18 }
  0x46   : > { %671 = vadd.xlane.f32.xlu0 %v664_v6  ;;  %918 = vmatpush1.bf16.msra.mxu0 %v4448_v31  ;;  %s4732_s13 = smov 64   ;;  %s4733_s29 = smov 32   ;;  %vm3619_vm5 = vcmask 1040384  }
  0x47   : > { %675 = vadd.xlane.f32.xlu1 %v666_v7  ;;  %919 = vmatprep.subr.bf16.mxu0 %v4449_v32  ;;  %s5613_s22 = scalar_lea.vmem %s5612_s20, %s4878_s18  ;;  %s5617_s17 = sld [smem:[#allocation9_spill]] }
  0x48   : > { %4120 = vmatpush3.bf16.msra.mxu1 %v4451_v33  ;;  %s3641_s19 = sshll.u32 %s4944_s28, 4  ;;  %s5621_s21 = sand.u32 1, %s4702_s26   ;;  %s3642_s19 = int_to_ptr.vmem [resolvable:$true] %s3641_s19 }
  0x49   : > { %4121 = vmatprep.subr.bf16.mxu1 %v4455_v36 }
  0x4a   : > { %920 = vmatpush1.bf16.msra.mxu0 %v4452_v34 }
  0x4b   : > { %921 = vmatprep.subr.bf16.mxu0 %v4453_v35 }
  0x4c   : > { %4122 = vmatpush3.bf16.msra.mxu1 %v4455_v36 }
  0x4d   : > { %4123 = vmatprep.subr.bf16.mxu1 %v4459_v39 }
  0x4e   : > { %922 = vmatpush1.bf16.msra.mxu0 %v4456_v37 }
  0x4f   : > { %923 = vmatprep.subr.bf16.mxu0 %v4457_v38 }
  0x50   : > { %4124 = vmatpush3.bf16.msra.mxu1 %v4459_v39 }
  0x51   : > { %4125 = vmatprep.subr.bf16.mxu1 %v4463_v42 }
  0x52   : > { %924 = vmatpush1.bf16.msra.mxu0 %v4460_v40 }
  0x53   : > { %925 = vmatprep.subr.bf16.mxu0 %v4461_v41 }
  0x54   : > { %4126 = vmatpush3.bf16.msra.mxu1 %v4463_v42 }
  0x55   : > { %4127 = vmatprep.subr.bf16.mxu1 %v4467_v46 }
  0x56   : > { %926 = vmatpush1.bf16.msra.mxu0 %v4464_v44 }
  0x57   : > { %927 = vmatprep.subr.bf16.mxu0 %v4465_v45 }
  0x58   : > { %4128 = vmatpush3.bf16.msra.mxu1 %v4467_v46 }
  0x59   : > { %4129 = vmatprep.subr.bf16.mxu1 %v4469_v48 }
  0x5a   : > { %928 = vmatpush1.bf16.msra.mxu0 %v4468_v47 }
  0x5c   : > { %4130 = vmatpush3.bf16.msra.mxu1 %v4469_v48 }
  0xcb   : > { %v670_v10 = vpop.xlane.xlu0 %669 }
  0xcc   : > { %v674_v11 = vpop.xlane.xlu1 %673  ;;  %v678_v12 = vmul.f32 0.0078125, %v670_v10 }
  0xcd   : > { %v680_v13 = vmul.f32 0.0078125, %v674_v11 }
  0xce   : > { %v4949_v14 = vsub.f32 %v663_v4, %v678_v12  ;;  %v3850_v4 = vld [vmem:[%s5613_s22] ss:$0 sm:$0xff] }
  0xcf   : > { %v4951_v15 = vsub.f32 %v665_v5, %v680_v13  ;;  %v672_v16 = vpop.xlane.xlu0 %671 }
  0xd0   : > { %v676_v17 = vpop.xlane.xlu1 %675  ;;  %v679_v18 = vmul.f32 0.0078125, %v672_v16  ;;  %v686_v19 = vmul.f32 %v4949_v14, %v4949_v14 }
  0xd1   : > { %v681_v20 = vmul.f32 0.0078125, %v676_v17  ;;  %v688_v23 = vmul.f32 %v4951_v15, %v4951_v15 }
  0xd2   : > { %v4955_v21 = vsub.f32 %v664_v6, %v679_v18  ;;  %690 = vadd.xlane.f32.xlu0 %v686_v19  ;;  %v770_v18 = vlaneseq }
  0xd3   : > { %v4957_v22 = vsub.f32 %v666_v7, %v681_v20 }
  0xd4   : > { %v687_v24 = vmul.f32 %v4955_v21, %v4955_v21  ;;  %v5010_v19 = vshrl.u32 %v770_v18, 7 }
  0xd5   : > { %v689_v25 = vmul.f32 %v4957_v22, %v4957_v22 }
  0xd6   : > { %694 = vadd.xlane.f32.xlu0 %v688_v23  ;;  %692 = vadd.xlane.f32.xlu1 %v687_v24  ;;  %v776_v20 = vsub.s32 1, %v5010_v19  ;;  %v772_v26 = vsub.s32 0, %v5010_v19 }
  0xda   : > { %696 = vadd.xlane.f32.xlu1 %v689_v25 }
 0x15b   : > { %v691_v49 = vpop.xlane.xlu0 %690 }
 0x15c   : > { %v698_v50 = vmul.f32 0.0078125, %v691_v49 }
 0x15e   : > { %v702_v51 = vadd.f32 1e-05, %v698_v50 }
 0x15f   : > { %v693_v52 = vpop.xlane.xlu1 %692  ;;  %v695_v53 = vpop.xlane.xlu0 %694 }
 0x160   : > { %4518 = vrsqrt.f32 %v702_v51  ;;  %v699_v54 = vmul.f32 0.0078125, %v693_v52  ;;  %v700_v55 = vmul.f32 0.0078125, %v695_v53 }
 0x162   : > { %v703_v56 = vadd.f32 1e-05, %v699_v54  ;;  %v704_v57 = vadd.f32 1e-05, %v700_v55 }
 0x163   : > { %v697_v58 = vpop.xlane.xlu1 %696 }
 0x164   : > { %4520 = vrsqrt.f32 %v703_v56  ;;  %v701_v59 = vmul.f32 0.0078125, %v697_v58 }
 0x165   : > { %4522 = vrsqrt.f32 %v704_v57 }
 0x166   : > { %v705_v60 = vadd.f32 1e-05, %v701_v59 }
 0x168   : > { %4524 = vrsqrt.f32 %v705_v60 }
 0x16d   : > { %v4519_v61 = vpop.eup %4518 }
 0x16e   : > { %v710_v62 = vmul.f32 %v4519_v61, %v4949_v14 }
 0x170   : > { %v720_v3 = vmul.f32 %v3849_v63, %v710_v62 }
 0x171   : > { %v4521_v0 = vpop.eup %4520 }
 0x172   : > { %v4523_v1 = vpop.eup %4522  ;;  %v711_v2 = vmul.f32 %v4521_v0, %v4955_v21  ;;  %v730_v8 = vadd.f32 %v3850_v4, %v720_v3  ;;  %v780_v21 = vsub.s32 2, %v5010_v19 }
 0x173   : > { %v712_v5 = vmul.f32 %v4523_v1, %v4951_v15  ;;  %v4729_v15 = vmov 0.0  }
 0x174   : > { %v721_v6 = vmul.f32 %v3849_v63, %v711_v2  ;;  %4135 = vmatprep.subr.bf16.mxu1 %v4729_v15  ;;  %4141 = vmatprep.subr.bf16.mxu0 %v4729_v15 }
 0x175   : > { %v4525_v7 = vpop.eup %4524  ;;  %v722_v11 = vmul.f32 %v3849_v63, %v712_v5 }
 0x176   : > { %v731_v9 = vadd.f32 %v3850_v4, %v721_v6  ;;  %v713_v10 = vmul.f32 %v4525_v7, %v4957_v22  ;;  %v768_v22 = vld [vmem:[%s4907_s27] sm:$0x7]  ;;  %s4731_s27 = smov 96  }
 0x177   : > { %v732_v14 = vadd.f32 %v3850_v4, %v722_v11  ;;  %v777_v23 = vrot.slane %v768_v22, %v776_v20  ;;  %v781_v25 = vrot.slane %v768_v22, %v780_v21  ;;  %v773_v33 = vrot.slane %v768_v22, %v772_v26 }
 0x178   : > { %v734_v12 = vpack.c.bf16 %v731_v9, %v730_v8  ;;  %v723_v13 = vmul.f32 %v3849_v63, %v713_v10 }
 0x17a   : > { %946 = vmatmul.mubr.bf16.vlgmr.msra.gmra.mxu0 %v734_v12  ;;  %4131 = vmatprep.mubr.bf16.mxu1 %v734_v12  ;;  %v733_v16 = vadd.f32 %v3850_v4, %v723_v13  ;;  %v5079_v4 = vand.u32 127, %v770_v18 }
 0x17b   : > { %955 = vmatprep.mubr.bf16.mxu0 %v4728_v43 }
 0x17c   : > { %v735_v17 = vpack.c.bf16 %v733_v16, %v732_v14  ;;  %vm1053_vm3 = vcmp.lt.s32.totalorder %v5079_v4, 5 }
 0x17e   : > { %4132 = vmatmul.mubr.bf16.vlgmr.msra.gmra.mxu1 %v735_v17 }
 0x17f   : > { %4137 = vmatprep.mubr.msk.bf16.mxu1 %vm4730_vm0, %v4729_v15 }
 0x182   : > { %956 = vmatmul.mubr.bf16.gmra.mxu0 %v735_v17 }
 0x183   : > { %4143 = vmatprep.mubr.msk.bf16.mxu0 %vm4730_vm0, %v4729_v15 }
 0x23a   : > { %v947_v24 = vpop.f32.mrf.mxu0 }
 0x23b   : > { %v948_v42 = vadd.f32 %v947_v24, %v773_v33 }
 0x23c   : > { %v949_v27 = vpop.f32.mrf.mxu0 }
 0x23d   : > { %v950_v28 = vadd.f32 %v949_v27, %v777_v23  ;;  %v5035_v49 = vpack.c.bf16 %v948_v42, %v948_v42 }
 0x23e   : > { %v951_v29 = vpop.f32.mrf.mxu0  ;;  %v4133_v30 = vpop.f32.mrf.mxu1 }
 0x23f   : > { %v5018_v31 = vpack.c.bf16 %v950_v28, %v950_v28  ;;  %v5020_v32 = vadd.f32 %v4133_v30, %v781_v25  ;;  %v952_v50 = vadd.f32 %v951_v29, %v773_v33 }
 0x240   : > { %v953_v34 = vpop.f32.mrf.mxu0  ;;  %v1000_v35 = vpop.f32.mrf.mxu1 }
 0x241   : > { %v954_v36 = vadd.f32 %v953_v34, %v777_v23  ;;  %v1070_v39 = vsel %vm1065_vm1, %v5018_v31, 0  ;;  %v1001_v54 = vadd.f32 %v1000_v35, %v781_v25  ;;  %v5046_v57 = vpack.c.bf16 %v952_v50, %v952_v50 }
 0x242   : > { %v957_v37 = vpop.f32.mrf.mxu0  ;;  %v4134_v38 = vpop.f32.mrf.mxu1  ;;  %4136 = vmatpush3.bf16.xpose.msra.mxu1 %v1070_v39 }
 0x243   : > { %v5026_v40 = vpack.c.bf16 %v954_v36, %v954_v36  ;;  %v5028_v41 = vadd.f32 %v4134_v38, %v781_v25  ;;  %4147 = vmatprep.subr.bf16.mxu1 %v4729_v15  ;;  %v958_v58 = vadd.f32 %v957_v37, %v773_v33  ;;  %v5051_v60 = vpack.c.bf16 %v1001_v54, %v1001_v54 }
 0x244   : > { %v959_v44 = vpop.f32.mrf.mxu0  ;;  %v1003_v55 = vpop.f32.mrf.mxu1 }
 0x245   : > { %v960_v45 = vadd.f32 %v959_v44, %v777_v23  ;;  %v1116_v47 = vsel %vm1065_vm1, %v5026_v40, 0  ;;  %v1004_v61 = vadd.f32 %v1003_v55, %v781_v25  ;;  %v5057_v62 = vpack.c.bf16 %v958_v58, %v958_v58 }
 0x246   : > { %v961_v46 = vpop.f32.mrf.mxu0  ;;  %4142 = vmatpush3.bf16.xpose.msra.mxu0 %v1116_v47  ;;  %v1310_v1 = vsel %vm1308_vm2, %v5051_v60, 0 }
 0x247   : > { %v5033_v48 = vpack.c.bf16 %v960_v45, %v960_v45  ;;  %4153 = vmatprep.subr.bf16.mxu0 %v4729_v15  ;;  %v962_v63 = vadd.f32 %v961_v46, %v773_v33  ;;  %v5060_v0 = vpack.c.bf16 %v1004_v61, %v1004_v61 }
 0x248   : > { %v963_v51 = vpop.f32.mrf.mxu0 }
 0x249   : > { %v964_v52 = vadd.f32 %v963_v51, %v777_v23  ;;  %v1162_v53 = vsel %vm1065_vm1, %v5033_v48, 0  ;;  %4138 = vmatmul.mubr.msk.bf16.vlgmr.msra.gmra.mxu1 %vm1065_vm1, %v5035_v49  ;;  %v5068_v2 = vpack.c.bf16 %v962_v63, %v962_v63  ;;  %v1356_v3 = vsel %vm1308_vm2, %v5060_v0, 0 }
 0x24a   : > { %4148 = vmatpush3.bf16.xpose.msra.mxu1 %v1162_v53  ;;  %4149 = vmatprep.mubr.msk.bf16.mxu1 %vm4730_vm0, %v4729_v15 }
 0x24b   : > { %v5042_v56 = vpack.c.bf16 %v964_v52, %v964_v52  ;;  %4159 = vmatprep.subr.bf16.mxu1 %v4729_v15 }
 0x24d   : > { %v1208_v59 = vsel %vm1065_vm1, %v5042_v56, 0  ;;  %4144 = vmatmul.mubr.msk.bf16.vlgmr.msra.gmra.mxu0 %vm1065_vm1, %v5046_v57 }
 0x24e   : > { %4154 = vmatpush3.bf16.xpose.msra.mxu0 %v1208_v59  ;;  %4155 = vmatprep.mubr.msk.bf16.mxu0 %vm4730_vm0, %v4729_v15 }
 0x24f   : > { %4165 = vmatprep.subr.bf16.mxu0 %v4729_v15 }
 0x251   : > { %4150 = vmatmul.mubr.msk.bf16.vlgmr.msra.gmra.mxu1 %vm1065_vm1, %v5057_v62 }
 0x252   : > { %4160 = vmatpush3.bf16.msra.mxu1 %v1310_v1  ;;  %4161 = vmatprep.mubr.msk.bf16.mxu1 %vm4730_vm0, %v4729_v15 }
 0x253   : > { %4171 = vmatprep.subr.bf16.mxu1 %v4729_v15 }
 0x255   : > { %4156 = vmatmul.mubr.msk.bf16.vlgmr.msra.gmra.mxu0 %vm1065_vm1, %v5068_v2 }
 0x256   : > { %4166 = vmatpush3.bf16.msra.mxu0 %v1356_v3  ;;  %4167 = vmatprep.mubr.msk.bf16.mxu0 %vm4730_vm0, %v4729_v15 }
 0x257   : > { %4177 = vmatprep.subr.bf16.mxu0 %v4729_v15 }
 0x309   : > { %v1106_v5 = vpop.f32.mrf.mxu1 }
 0x30a   : > { %v1252_v6 = vsel %vm1053_vm3, %v1106_v5, -1e+30 }
 0x30b   : > { %v4139_v7 = vpop.f32.mrf.mxu1  ;;  %v1257_v8 = vsel %vm1256_vm4, %v1252_v6, -inf }
 0x30c   : > { %1258 = vmax.xlane.f32.xlu0 %v1257_v8  ;;  %v5116_v8 = vpack.c.bf16 %v5020_v32, %v5020_v32 }
 0x30d   : > { %v1109_v9 = vpop.f32.mrf.mxu1  ;;  %v1152_v10 = vpop.f32.mrf.mxu0 }
 0x30e   : > { %v1253_v11 = vsel %vm1053_vm3, %v1152_v10, -1e+30 }
 0x30f   : > { %v4140_v12 = vpop.f32.mrf.mxu1  ;;  %v4145_v13 = vpop.f32.mrf.mxu0  ;;  %v1260_v14 = vsel %vm1256_vm4, %v1253_v11, -inf }
 0x310   : > { %1261 = vmax.xlane.f32.xlu1 %v1260_v14  ;;  %v5120_v12 = vpack.c.bf16 %v5028_v41, %v5028_v41  ;;  %v1402_v13 = vsel %vm1308_vm2, %v5116_v8, 0 }
 0x311   : > { %v1155_v16 = vpop.f32.mrf.mxu0  ;;  %v1198_v17 = vpop.f32.mrf.mxu1 }
 0x312   : > { %v1254_v18 = vsel %vm1053_vm3, %v1198_v17, -1e+30  ;;  %v1448_v17 = vsel %vm1308_vm2, %v5120_v12, 0 }
 0x313   : > { %v4146_v21 = vpop.f32.mrf.mxu0  ;;  %v4151_v22 = vpop.f32.mrf.mxu1  ;;  %v1263_v23 = vsel %vm1256_vm4, %v1254_v18, -inf }
 0x314   : > { %1264 = vmax.xlane.f32.xlu0 %v1263_v23 }
 0x315   : > { %v1201_v24 = vpop.f32.mrf.mxu1  ;;  %v1244_v25 = vpop.f32.mrf.mxu0 }
 0x316   : > { %v1255_v27 = vsel %vm1053_vm3, %v1244_v25, -1e+30 }
 0x317   : > { %v4152_v28 = vpop.f32.mrf.mxu1  ;;  %v4157_v29 = vpop.f32.mrf.mxu0  ;;  %v1266_v30 = vsel %vm1256_vm4, %v1255_v27, -inf }
 0x318   : > { %1267 = vmax.xlane.f32.xlu1 %v1266_v30 }
 0x319   : > { %v1247_v33 = vpop.f32.mrf.mxu0 }
 0x31b   : > { %v4158_v34 = vpop.f32.mrf.mxu0 }
 0x31c   : > { %v4470_v34 = vld [vmem:[%s4902_s23 + $0x8] sm:$0xff]  }
 0x395   : > { %v1259_v35 = vpop.xlane.xlu0 %1258 }
 0x396   : > { %v1269_v36 = vsub.f32 %v1252_v6, %v1259_v35  ;;  %v4471_v35 = vld [vmem:[%s4902_s23] sm:$0xff]  }
 0x398   : > { %v1273_v37 = vmul.f32 1.442695, %v1269_v36 }
 0x399   : > { %v1262_v38 = vpop.xlane.xlu1 %1261 }
 0x39a   : > { %4526 = vpow2.f32 %v1273_v37  ;;  %v1270_v39 = vsub.f32 %v1253_v11, %v1262_v38 }
 0x39c   : > { %v1275_v42 = vmul.f32 1.442695, %v1270_v39 }
 0x39d   : > { %v1265_v44 = vpop.xlane.xlu0 %1264 }
 0x39e   : > { %4528 = vpow2.f32 %v1275_v42  ;;  %v1271_v45 = vsub.f32 %v1254_v18, %v1265_v44 }
 0x3a0   : > { %v1277_v46 = vmul.f32 1.442695, %v1271_v45 }
 0x3a1   : > { %v1268_v47 = vpop.xlane.xlu1 %1267 }
 0x3a2   : > { %4530 = vpow2.f32 %v1277_v46  ;;  %v1272_v50 = vsub.f32 %v1255_v27, %v1268_v47 }
 0x3a4   : > { %v1279_v51 = vmul.f32 1.442695, %v1272_v50 }
 0x3a6   : > { %4532 = vpow2.f32 %v1279_v51 }
 0x3a7   : > { %v4527_v52 = vpop.eup %4526 }
 0x3a8   : > { %v1281_v53 = vsel %vm1256_vm4, %v4527_v52, 0.0 }
 0x3a9   : > { %1282 = vadd.xlane.f32.xlu0 %v1281_v53 }
 0x3ab   : > { %v4529_v54 = vpop.eup %4528 }
 0x3ac   : > { %v1284_v55 = vsel %vm1256_vm4, %v4529_v54, 0.0 }
 0x3ad   : > { %1285 = vadd.xlane.f32.xlu1 %v1284_v55 }
 0x3af   : > { %v4531_v58 = vpop.eup %4530 }
 0x3b0   : > { %v1287_v59 = vsel %vm1256_vm4, %v4531_v58, 0.0 }
 0x3b1   : > { %1288 = vadd.xlane.f32.xlu0 %v1287_v59 }
 0x3b3   : > { %v4533_v61 = vpop.eup %4532 }
 0x3b4   : > { %v1290_v63 = vsel %vm1256_vm4, %v4533_v61, 0.0 }
 0x3b5   : > { %1291 = vadd.xlane.f32.xlu1 %v1290_v63 }
 0x3c6   : > { %1619 = vrot.lane.b32.xlu1 %v5026_v40, %s4731_s27 }
 0x3c7   : > { %1569 = vrot.lane.b32.xlu0 %v5018_v31, %s4731_s27 }
 0x3ca   : > { %1567 = vrot.lane.b32.xlu1 %v5035_v49, %s4731_s27 }
 0x3cb   : > { %1669 = vrot.lane.b32.xlu0 %v5033_v48, %s4731_s27 }
 0x3ce   : > { %1617 = vrot.lane.b32.xlu1 %v5046_v57, %s4731_s27 }
 0x3cf   : > { %1667 = vrot.lane.b32.xlu0 %v5057_v62, %s4731_s27 }
 0x3d2   : > { %1719 = vrot.lane.b32.xlu1 %v5042_v56, %s4731_s27 }
 0x3d6   : > { %1717 = vrot.lane.b32.xlu1 %v5068_v2, %s4731_s27 }
 0x432   : > { %v1283_v1 = vpop.xlane.xlu0 %1282 }
 0x433   : > { %4534 = vrcp.f32 %v1283_v1 }
 0x436   : > { %v1286_v3 = vpop.xlane.xlu1 %1285 }
 0x437   : > { %4536 = vrcp.f32 %v1286_v3 }
 0x43a   : > { %v1289_v5 = vpop.xlane.xlu0 %1288 }
 0x43b   : > { %4538 = vrcp.f32 %v1289_v5 }
 0x43e   : > { %v1292_v6 = vpop.xlane.xlu1 %1291  ;;  %v1570_v23 = vpop.permute.xlu0 %1569 }
 0x43f   : > { %4540 = vrcp.f32 %v1292_v6  ;;  %v1575_v25 = vsel %vm1065_vm1, %v1570_v23, 0 }
 0x440   : > { %v4535_v7 = vpop.eup %4534 }
 0x441   : > { %v1294_v9 = vmul.f32 %v4535_v7, %v4527_v52 }
 0x442   : > { %v1620_v27 = vpop.permute.xlu1 %1619  ;;  %v1670_v28 = vpop.permute.xlu0 %1669 }
 0x443   : > { %v1301_v10 = vpack.c.bf16 %v1294_v9, %v1294_v9  ;;  %v1675_v30 = vsel %vm1065_vm1, %v1670_v28, 0 }
 0x444   : > { %v4537_v11 = vpop.eup %4536 }
 0x445   : > { %4162 = vmatmul.mubr.msk.bf16.vlgmr.msra.gmra.mxu1 %vm1256_vm4, %v1301_v10  ;;  %v1296_v14 = vmul.f32 %v4537_v11, %v4529_v54 }
 0x446   : > { %4172 = vmatpush3.bf16.msra.mxu1 %v1402_v13  ;;  %4173 = vmatprep.mubr.msk.bf16.mxu1 %vm4730_vm0, %v4729_v15  ;;  %v1568_v29 = vpop.permute.xlu1 %1567  ;;  %v1668_v33 = vpop.permute.xlu0 %1667 }
 0x447   : > { %v1302_v16 = vpack.c.bf16 %v1296_v14, %v1296_v14  ;;  %4183 = vmatprep.subr.bf16.mxu1 %v4470_v34 }
 0x448   : > { %v4539_v32 = vpop.eup %4538 }
 0x449   : > { %4168 = vmatmul.mubr.msk.bf16.vlgmr.msra.gmra.mxu0 %vm1256_vm4, %v1302_v16  ;;  %v1298_v18 = vmul.f32 %v4539_v32, %v4531_v58 }
 0x44a   : > { %4178 = vmatpush3.bf16.msra.mxu0 %v1448_v17  ;;  %4179 = vmatprep.mubr.msk.bf16.mxu0 %vm4730_vm0, %v4729_v15  ;;  %v1618_v54 = vpop.permute.xlu1 %1617 }
 0x44b   : > { %v1303_v41 = vpack.c.bf16 %v1298_v18, %v1298_v18  ;;  %4191 = vmatprep.subr.bf16.mxu0 %v4729_v15 }
 0x44c   : > { %v4541_v21 = vpop.eup %4540 }
 0x44d   : > { %4174 = vmatmul.mubr.msk.bf16.vlgmr.msra.gmra.mxu1 %vm1256_vm4, %v1303_v41  ;;  %v1300_v22 = vmul.f32 %v4541_v21, %v4533_v61  ;;  %v1625_v61 = vsel %vm1065_vm1, %v1620_v27, 0 }
 0x44e   : > { %4184 = vmatpush3.bf16.msra.mxu1 %v4470_v34  ;;  %v1720_v3 = vpop.permute.xlu1 %1719 }
 0x44f   : > { %v1304_v24 = vpack.c.bf16 %v1300_v22, %v1300_v22  ;;  %4185 = vmatprep.subr.bf16.mxu1 %v4471_v35  ;;  %v1725_v10 = vsel %vm1065_vm1, %v1720_v3, 0 }
 0x451   : > { %4180 = vmatmul.mubr.msk.bf16.vlgmr.msra.gmra.mxu0 %vm1256_vm4, %v1304_v24 }
 0x452   : > { %4192 = vmatpush3.bf16.xpose.msra.mxu0 %v1575_v25  ;;  %4193 = vmatprep.mubr.msk.bf16.mxu0 %vm4730_vm0, %v4729_v15  ;;  %v1718_v32 = vpop.permute.xlu1 %1717 }
 0x453   : > { %4203 = vmatprep.subr.bf16.mxu0 %v4729_v15  ;;  %4186 = vmatpush3.bf16.msra.mxu1 %v4471_v35 }
 0x454   : > { %4197 = vmatprep.subr.bf16.mxu1 %v4729_v15 }
 0x459   : > { %4194 = vmatmul.mubr.msk.bf16.vlgmr.msra.gmra.mxu0 %vm1065_vm1, %v1568_v29 }
 0x45a   : > { %4204 = vmatpush3.bf16.xpose.msra.mxu0 %v1675_v30  ;;  %4205 = vmatprep.mubr.msk.bf16.mxu0 %vm4730_vm0, %v4729_v15 }
 0x45b   : > { %4215 = vmatprep.subr.bf16.mxu0 %v4729_v15 }
 0x461   : > { %4206 = vmatmul.mubr.msk.bf16.vlgmr.msra.gmra.mxu0 %vm1065_vm1, %v1668_v33 }
 0x462   : > { %4217 = vmatprep.mubr.msk.bf16.mxu0 %vm4730_vm0, %v4729_v15 }
 0x505   : > { %v1346_v36 = vpop.f32.mrf.mxu1 }
 0x507   : > { %v4163_v37 = vpop.f32.mrf.mxu1 }
 0x509   : > { %v1349_v38 = vpop.f32.mrf.mxu1  ;;  %v1392_v39 = vpop.f32.mrf.mxu0 }
 0x50a   : > { %v1490_v42 = vpack.c.bf16 %v1392_v39, %v1346_v36 }
 0x50b   : > { %v4164_v44 = vpop.f32.mrf.mxu1  ;;  %v4169_v45 = vpop.f32.mrf.mxu0 }
 0x50c   : > { %4187 = vmatprep.mubr.msk.bf16.mxu1 %vm1065_vm1, %v1490_v42 }
 0x50d   : > { %v1395_v46 = vpop.f32.mrf.mxu0  ;;  %v1438_v47 = vpop.f32.mrf.mxu1 }
 0x50f   : > { %v4170_v50 = vpop.f32.mrf.mxu0  ;;  %v4175_v51 = vpop.f32.mrf.mxu1 }
 0x511   : > { %v1441_v52 = vpop.f32.mrf.mxu1  ;;  %v1484_v53 = vpop.f32.mrf.mxu0 }
 0x512   : > { %v1491_v55 = vpack.c.bf16 %v1484_v53, %v1438_v47 }
 0x513   : > { %v4176_v58 = vpop.f32.mrf.mxu1  ;;  %v4181_v59 = vpop.f32.mrf.mxu0 }
 0x514   : > { %4188 = vmatmul.mubr.msk.bf16.vlgmr.msra.gmra.mxu1 %vm1065_vm1, %v1491_v55 }
 0x515   : > { %4198 = vmatpush3.bf16.xpose.msra.mxu1 %v1625_v61  ;;  %v1487_v63 = vpop.f32.mrf.mxu0  ;;  %4199 = vmatprep.mubr.msk.bf16.mxu1 %vm4730_vm0, %v4729_v15 }
 0x516   : > { %4209 = vmatprep.subr.bf16.mxu1 %v4729_v15 }
 0x517   : > { %v4182_v1 = vpop.f32.mrf.mxu0 }
 0x519   : > { %v1611_v5 = vpop.f32.mrf.mxu0 }
 0x51a   : > { %v1767_v6 = vsel %vm1053_vm3, %v1611_v5, -1e+30 }
 0x51b   : > { %v4195_v7 = vpop.f32.mrf.mxu0  ;;  %v1771_v9 = vsel %vm1256_vm4, %v1767_v6, -inf }
 0x51c   : > { %1772 = vmax.xlane.f32.xlu0 %v1771_v9  ;;  %4200 = vmatmul.mubr.msk.bf16.vlgmr.msra.gmra.mxu1 %vm1065_vm1, %v1618_v54 }
 0x51d   : > { %4210 = vmatpush3.bf16.xpose.msra.mxu1 %v1725_v10  ;;  %v1614_v11 = vpop.f32.mrf.mxu0  ;;  %4211 = vmatprep.mubr.msk.bf16.mxu1 %vm4730_vm0, %v4729_v15 }
 0x51e   : > { %4221 = vmatprep.subr.bf16.mxu1 %v4729_v15 }
 0x51f   : > { %v4196_v13 = vpop.f32.mrf.mxu0 }
 0x521   : > { %v1711_v14 = vpop.f32.mrf.mxu0 }
 0x522   : > { %v1769_v16 = vsel %vm1053_vm3, %v1711_v14, -1e+30 }
 0x523   : > { %v4207_v17 = vpop.f32.mrf.mxu0  ;;  %v1777_v18 = vsel %vm1256_vm4, %v1769_v16, -inf }
 0x524   : > { %1778 = vmax.xlane.f32.xlu0 %v1777_v18  ;;  %4212 = vmatmul.mubr.msk.bf16.vlgmr.msra.gmra.mxu1 %vm1065_vm1, %v1718_v32 }
 0x525   : > { %v1714_v41 = vpop.f32.mrf.mxu0  ;;  %4223 = vmatprep.mubr.msk.bf16.mxu1 %vm4730_vm0, %v4729_v15 }
 0x527   : > { %v4208_v21 = vpop.f32.mrf.mxu0 }
 0x5a5   : > { %v1773_v22 = vpop.xlane.xlu0 %1772 }
 0x5a6   : > { %v1783_v23 = vsub.f32 %v1767_v6, %v1773_v22 }
 0x5a8   : > { %v1787_v27 = vmul.f32 1.442695, %v1783_v23 }
 0x5aa   : > { %4542 = vpow2.f32 %v1787_v27 }
 0x5ad   : > { %v1779_v24 = vpop.xlane.xlu0 %1778 }
 0x5ae   : > { %v1785_v28 = vsub.f32 %v1769_v16, %v1779_v24 }
 0x5b0   : > { %v1791_v33 = vmul.f32 1.442695, %v1785_v28 }
 0x5b2   : > { %4544 = vpow2.f32 %v1791_v33 }
 0x5b7   : > { %v4543_v50 = vpop.eup %4542 }
 0x5b8   : > { %v1795_v53 = vsel %vm1256_vm4, %v4543_v50, 0.0 }
 0x5bf   : > { %v4545_v54 = vpop.eup %4544 }
 0x5c0   : > { %v1801_v55 = vsel %vm1256_vm4, %v4545_v54, 0.0 }
 0x5d4   : > { %v5170_v25 = vpop.f32.mrf.mxu1 }
 0x5d6   : > { %v5172_v29 = vpop.f32.mrf.mxu1 }
 0x5d8   : > { %v5174_v30 = vpop.f32.mrf.mxu1 }
 0x5da   : > { %v5176_v34 = vpop.f32.mrf.mxu1 }
 0x5dc   : > { %v1661_v35 = vpop.f32.mrf.mxu1 }
 0x5dd   : > { %v1768_v36 = vsel %vm1053_vm3, %v1661_v35, -1e+30 }
 0x5de   : > { %v4201_v37 = vpop.f32.mrf.mxu1  ;;  %v1774_v38 = vsel %vm1256_vm4, %v1768_v36, -inf }
 0x5df   : > { %1775 = vmax.xlane.f32.xlu1 %v1774_v38 }
 0x5e0   : > { %v1664_v39 = vpop.f32.mrf.mxu1 }
 0x5e2   : > { %v4202_v42 = vpop.f32.mrf.mxu1 }
 0x5e4   : > { %v1761_v44 = vpop.f32.mrf.mxu1 }
 0x5e5   : > { %v1770_v45 = vsel %vm1053_vm3, %v1761_v44, -1e+30 }
 0x5e6   : > { %v4213_v46 = vpop.f32.mrf.mxu1  ;;  %v1780_v47 = vsel %vm1256_vm4, %v1770_v45, -inf }
 0x5e7   : > { %1781 = vmax.xlane.f32.xlu0 %v1780_v47 }
 0x5e8   : > { %v1764_v51 = vpop.f32.mrf.mxu1 }
 0x5ea   : > { %v4214_v52 = vpop.f32.mrf.mxu1 }
 0x5eb   : > { %1796 = vadd.xlane.f32.xlu0 %v1795_v53 }
 0x5ef   : > { %1802 = vadd.xlane.f32.xlu0 %v1801_v55 }
 0x5f0   : > { %1867 = vrot.lane.b32.xlu1 %v5060_v0, %s4731_s27 }
 0x5f4   : > { %1915 = vrot.lane.b32.xlu1 %v5116_v8, %s4731_s27 }
 0x605   : > { %1819 = vrot.lane.b32.xlu0 %v5051_v60, %s4731_s27 }
 0x609   : > { %2090 = vrot.lane.b32.xlu0 %v5018_v31, %s4732_s13 }
 0x60d   : > { %2088 = vrot.lane.b32.xlu0 %v5035_v49, %s4732_s13 }
 0x611   : > { %2190 = vrot.lane.b32.xlu0 %v5033_v48, %s4732_s13 }
 0x615   : > { %2188 = vrot.lane.b32.xlu0 %v5057_v62, %s4732_s13 }
 0x668   : > { %v1776_v58 = vpop.xlane.xlu1 %1775 }
 0x669   : > { %v1784_v59 = vsub.f32 %v1768_v36, %v1776_v58 }
 0x66b   : > { %v1789_v61 = vmul.f32 1.442695, %v1784_v59 }
 0x66c   : > { %v1868_v63 = vpop.permute.xlu1 %1867 }
 0x66d   : > { %4546 = vpow2.f32 %v1789_v61  ;;  %v1873_v1 = vsel %vm1308_vm2, %v1868_v63, 0 }
 0x66e   : > { %4222 = vmatpush3.bf16.msra.mxu1 %v1873_v1 }
 0x66f   : > { %4233 = vmatprep.subr.bf16.mxu1 %v4729_v15 }
 0x670   : > { %v1782_v3 = vpop.xlane.xlu0 %1781  ;;  %v1916_v41 = vpop.permute.xlu1 %1915 }
 0x671   : > { %v1786_v5 = vsub.f32 %v1770_v45, %v1782_v3  ;;  %v1921_v23 = vsel %vm1308_vm2, %v1916_v41, 0 }
 0x673   : > { %v1793_v6 = vmul.f32 1.442695, %v1786_v5  ;;  %v4472_v5 = vld [vmem:[%s4902_s23 + $0x18] sm:$0xff]  }
 0x674   : > { %v1797_v7 = vpop.xlane.xlu0 %1796 }
 0x675   : > { %4548 = vpow2.f32 %v1793_v6  ;;  %v4473_v6 = vld [vmem:[%s4902_s23 + $0x10] sm:$0xff]  }
 0x676   : > { %4550 = vrcp.f32 %v1797_v7 }
 0x678   : > { %v1803_v9 = vpop.xlane.xlu0 %1802 }
 0x679   : > { %4552 = vrcp.f32 %v1803_v9 }
 0x67a   : > { %v4547_v10 = vpop.eup %4546 }
 0x67b   : > { %v1798_v11 = vsel %vm1256_vm4, %v4547_v10, 0.0 }
 0x67c   : > { %1799 = vadd.xlane.f32.xlu1 %v1798_v11  ;;  %v1820_v13 = vpop.permute.xlu0 %1819 }
 0x67d   : > { %v1825_v14 = vsel %vm1308_vm2, %v1820_v13, 0 }
 0x67e   : > { %4216 = vmatpush3.bf16.msra.mxu0 %v1825_v14 }
 0x67f   : > { %4227 = vmatprep.subr.bf16.mxu0 %v4729_v15 }
 0x680   : > { %v2091_v42 = vpop.permute.xlu0 %2090 }
 0x682   : > { %v4549_v16 = vpop.eup %4548 }
 0x683   : > { %v4551_v32 = vpop.eup %4550  ;;  %v1804_v17 = vsel %vm1256_vm4, %v4549_v16, 0.0 }
 0x684   : > { %1805 = vadd.xlane.f32.xlu1 %v1804_v17  ;;  %v1808_v18 = vmul.f32 %v4551_v32, %v4543_v50  ;;  %v2089_v47 = vpop.permute.xlu0 %2088  ;;  %v2096_v50 = vsel %vm1065_vm1, %v2091_v42, 0 }
 0x686   : > { %v1815_v21 = vpack.c.bf16 %v1808_v18, %v1808_v18  ;;  %v4553_v22 = vpop.eup %4552 }
 0x687   : > { %v1812_v24 = vmul.f32 %v4553_v22, %v4545_v54 }
 0x688   : > { %4218 = vmatmul.mubr.msk.bf16.vlgmr.msra.gmra.mxu0 %vm1256_vm4, %v1815_v21  ;;  %v2191_v51 = vpop.permute.xlu0 %2190 }
 0x689   : > { %4228 = vmatpush3.bf16.msra.mxu0 %v1921_v23  ;;  %4229 = vmatprep.mubr.msk.bf16.mxu0 %vm4730_vm0, %v4729_v15  ;;  %v1817_v27 = vpack.c.bf16 %v1812_v24, %v1812_v24  ;;  %v2196_v52 = vsel %vm1065_vm1, %v2191_v51, 0  ;;  %v4630_v51 = vld [vmem:[#allocation2 + $0x18] sm:$0xff] }
 0x68a   : > { %4239 = vmatprep.subr.bf16.mxu0 %v4472_v5 }
 0x68c   : > { %v2189_v53 = vpop.permute.xlu0 %2188 }
 0x690   : > { %4230 = vmatmul.mubr.msk.bf16.vlgmr.msra.gmra.mxu0 %vm1256_vm4, %v1817_v27 }
 0x691   : > { %4240 = vmatpush3.bf16.msra.mxu0 %v4472_v5 }
 0x692   : > { %4241 = vmatprep.subr.bf16.mxu0 %v4473_v6 }
 0x695   : > { %1963 = vrot.lane.b32.xlu1 %v5120_v12, %s4731_s27  ;;  %4242 = vmatpush3.bf16.msra.mxu0 %v4473_v6  ;;  %v4633_v6 = vld [vmem:[#allocation2] sm:$0xff]  ;;  %s5619_s27 = sld [smem:[#allocation22_spill]] }
 0x696   : > { %4253 = vmatprep.subr.bf16.mxu0 %v4729_v15 }
 0x699   : > { %2140 = vrot.lane.b32.xlu1 %v5026_v40, %s4732_s13 }
 0x69d   : > { %2138 = vrot.lane.b32.xlu1 %v5046_v57, %s4732_s13 }
 0x6a1   : > { %2240 = vrot.lane.b32.xlu1 %v5042_v56, %s4732_s13 }
 0x6a5   : > { %2238 = vrot.lane.b32.xlu1 %v5068_v2, %s4732_s13 }
 0x705   : > { %v1800_v28 = vpop.xlane.xlu1 %1799 }
 0x706   : > { %4554 = vrcp.f32 %v1800_v28 }
 0x70d   : > { %v1806_v33 = vpop.xlane.xlu1 %1805 }
 0x70e   : > { %4556 = vrcp.f32 %v1806_v33 }
 0x711   : > { %v1964_v37 = vpop.permute.xlu1 %1963 }
 0x712   : > { %v1969_v39 = vsel %vm1308_vm2, %v1964_v37, 0 }
 0x713   : > { %v4555_v35 = vpop.eup %4554 }
 0x714   : > { %v1810_v36 = vmul.f32 %v4555_v35, %v4547_v10 }
 0x715   : > { %v2141_v11 = vpop.permute.xlu1 %2140 }
 0x716   : > { %v1816_v38 = vpack.c.bf16 %v1810_v36, %v1810_v36  ;;  %v2146_v41 = vsel %vm1065_vm1, %v2141_v11, 0 }
 0x718   : > { %4224 = vmatmul.mubr.msk.bf16.vlgmr.msra.gmra.mxu1 %vm1256_vm4, %v1816_v38 }
 0x719   : > { %4234 = vmatpush3.bf16.msra.mxu1 %v1969_v39  ;;  %4235 = vmatprep.mubr.msk.bf16.mxu1 %vm4730_vm0, %v4729_v15  ;;  %v2139_v17 = vpop.permute.xlu1 %2138 }
 0x71a   : > { %4247 = vmatprep.subr.bf16.mxu1 %v4729_v15 }
 0x71b   : > { %v4557_v44 = vpop.eup %4556 }
 0x71c   : > { %v1814_v45 = vmul.f32 %v4557_v44, %v4549_v16 }
 0x71d   : > { %v2241_v23 = vpop.permute.xlu1 %2240 }
 0x71e   : > { %v1818_v46 = vpack.c.bf16 %v1814_v45, %v1814_v45  ;;  %v2246_v35 = vsel %vm1065_vm1, %v2241_v23, 0 }
 0x720   : > { %4236 = vmatmul.mubr.msk.bf16.vlgmr.msra.gmra.mxu1 %vm1256_vm4, %v1818_v46 }
 0x721   : > { %4248 = vmatpush3.bf16.xpose.msra.mxu1 %v2096_v50  ;;  %4249 = vmatprep.mubr.msk.bf16.mxu1 %vm4730_vm0, %v4729_v15  ;;  %v2239_v42 = vpop.permute.xlu1 %2238  ;;  %v3887_v50 = vld [vmem:[%s5614_s2] ss:$0 sm:$0xff]  ;;  %s3629_s2 = scalar_lea.sflag [#allocation4], %s5621_s21 }
 0x722   : > { %4259 = vmatprep.subr.bf16.mxu1 %v4729_v15 }
 0x728   : > { %4250 = vmatmul.mubr.msk.bf16.vlgmr.msra.gmra.mxu1 %vm1065_vm1, %v2089_v47 }
 0x729   : > { %4260 = vmatpush3.bf16.xpose.msra.mxu1 %v2196_v52  ;;  %4261 = vmatprep.mubr.msk.bf16.mxu1 %vm4730_vm0, %v4729_v15  ;;  %v1063_v52 = vadd.f32 %v4630_v51, %v3887_v50 }
 0x72a   : > { %4271 = vmatprep.subr.bf16.mxu1 %v4729_v15 }
 0x730   : > { %4262 = vmatmul.mubr.msk.bf16.vlgmr.msra.gmra.mxu1 %vm1065_vm1, %v2189_v53 }
 0x731   : > { %4273 = vmatprep.mubr.msk.bf16.mxu1 %vm4730_vm0, %v4729_v15 }
 0x748   : > { %v1861_v54 = vpop.f32.mrf.mxu0 }
 0x74a   : > { %v4219_v55 = vpop.f32.mrf.mxu0 }
 0x74c   : > { %v1864_v58 = vpop.f32.mrf.mxu0 }
 0x74e   : > { %v4220_v59 = vpop.f32.mrf.mxu0 }
 0x74f   : > { %v1565_v59 = vadd.f32 %v5170_v25, %v1063_v52 }
 0x750   : > { %v1957_v61 = vpop.f32.mrf.mxu0 }
 0x752   : > { %v4231_v63 = vpop.f32.mrf.mxu0 }
 0x754   : > { %v1960_v1 = vpop.f32.mrf.mxu0 }
 0x756   : > { %v4232_v3 = vpop.f32.mrf.mxu0 }
 0x7d8   : > { %v1909_v7 = vpop.f32.mrf.mxu1 }
 0x7d9   : > { %v2011_v9 = vpack.c.bf16 %v1909_v7, %v1861_v54  ;;  %v4631_v54 = vld [vmem:[#allocation2 + $0x10] sm:$0xff]  ;;  %v1062_v7 = vadd.f32 %v4633_v6, %v3887_v50 }
 0x7da   : > { %v4225_v10 = vpop.f32.mrf.mxu1  ;;  %v1061_v55 = vadd.f32 %v4631_v54, %v3887_v50 }
 0x7db   : > { %4243 = vmatprep.mubr.msk.bf16.mxu0 %vm1065_vm1, %v2011_v9  ;;  %v1564_v25 = vadd.f32 %v5176_v34, %v1062_v7 }
 0x7dc   : > { %v1912_v13 = vpop.f32.mrf.mxu1  ;;  %v1563_v5 = vadd.f32 %v5172_v29, %v1061_v55 }
 0x7de   : > { %v4226_v14 = vpop.f32.mrf.mxu1 }
 0x7e0   : > { %v2005_v16 = vpop.f32.mrf.mxu1 }
 0x7e1   : > { %v2012_v32 = vpack.c.bf16 %v2005_v16, %v1957_v61  ;;  %v4632_v61 = vld [vmem:[#allocation2 + $0x8] sm:$0xff] }
 0x7e2   : > { %v4237_v18 = vpop.f32.mrf.mxu1  ;;  %v1064_v63 = vadd.f32 %v4632_v61, %v3887_v50 }
 0x7e3   : > { %4244 = vmatmul.mubr.msk.bf16.vlgmr.msra.gmra.mxu0 %vm1065_vm1, %v2012_v32 }
 0x7e4   : > { %4254 = vmatpush3.bf16.xpose.msra.mxu0 %v2146_v41  ;;  %v2008_v21 = vpop.f32.mrf.mxu1  ;;  %4255 = vmatprep.mubr.msk.bf16.mxu0 %vm4730_vm0, %v4729_v15  ;;  %v1566_v14 = vadd.f32 %v5174_v30, %v1064_v63 }
 0x7e5   : > { %4265 = vmatprep.subr.bf16.mxu0 %v4729_v15 }
 0x7e6   : > { %v4238_v22 = vpop.f32.mrf.mxu1 }
 0x7e8   : > { %v2132_v24 = vpop.f32.mrf.mxu1 }
 0x7e9   : > { %v2288_v27 = vsel %vm1053_vm3, %v2132_v24, -1e+30 }
 0x7ea   : > { %v4251_v28 = vpop.f32.mrf.mxu1  ;;  %v2292_v33 = vsel %vm1256_vm4, %v2288_v27, -inf }
 0x7eb   : > { %4256 = vmatmul.mubr.msk.bf16.vlgmr.msra.gmra.mxu0 %vm1065_vm1, %v2139_v17  ;;  %2293 = vmax.xlane.f32.xlu0 %v2292_v33 }
 0x7ec   : > { %4266 = vmatpush3.bf16.xpose.msra.mxu0 %v2246_v35  ;;  %v2135_v36 = vpop.f32.mrf.mxu1  ;;  %4267 = vmatprep.mubr.msk.bf16.mxu0 %vm4730_vm0, %v4729_v15 }
 0x7ed   : > { %4277 = vmatprep.subr.bf16.mxu0 %v4729_v15 }
 0x7ee   : > { %v4252_v37 = vpop.f32.mrf.mxu1 }
 0x7f0   : > { %v2232_v38 = vpop.f32.mrf.mxu1 }
 0x7f1   : > { %v2290_v39 = vsel %vm1053_vm3, %v2232_v38, -1e+30 }
 0x7f2   : > { %v4263_v44 = vpop.f32.mrf.mxu1  ;;  %v2298_v45 = vsel %vm1256_vm4, %v2290_v39, -inf }
 0x7f3   : > { %4268 = vmatmul.mubr.msk.bf16.vlgmr.msra.gmra.mxu0 %vm1065_vm1, %v2239_v42  ;;  %2299 = vmax.xlane.f32.xlu0 %v2298_v45 }
 0x7f4   : > { %v2235_v46 = vpop.f32.mrf.mxu1  ;;  %4279 = vmatprep.mubr.msk.bf16.mxu0 %vm4730_vm0, %v4729_v15 }
 0x7f6   : > { %v4264_v47 = vpop.f32.mrf.mxu1 }
 0x874   : > { %v2294_v53 = vpop.xlane.xlu0 %2293 }
 0x875   : > { %v2304_v58 = vsub.f32 %v2288_v27, %v2294_v53 }
 0x877   : > { %v2308_v10 = vmul.f32 1.442695, %v2304_v58 }
 0x879   : > { %4558 = vpow2.f32 %v2308_v10 }
 0x87c   : > { %v2300_v1 = vpop.xlane.xlu0 %2299 }
 0x87d   : > { %v2306_v11 = vsub.f32 %v2290_v39, %v2300_v1 }
 0x87f   : > { %v2312_v18 = vmul.f32 1.442695, %v2306_v11 }
 0x881   : > { %4560 = vpow2.f32 %v2312_v18 }
 0x886   : > { %v4559_v36 = vpop.eup %4558 }
 0x887   : > { %v2316_v39 = vsel %vm1256_vm4, %v4559_v36, 0.0 }
 0x88e   : > { %v4561_v42 = vpop.eup %4560 }
 0x88f   : > { %v2322_v44 = vsel %vm1256_vm4, %v4561_v42, 0.0 }
 0x8a3   : > { %v4245_v3 = vpop.f32.mrf.mxu0 }
 0x8a4   : > { %v5269_v9 = vadd.f32 %v4245_v3, %v1565_v59 }
 0x8a5   : > { %v2069_v13 = vpop.f32.mrf.mxu0 }
 0x8a6   : > { %v5272_v16 = vadd.f32 %v2069_v13, %v1563_v5 }
 0x8a7   : > { %v4246_v32 = vpop.f32.mrf.mxu0 }
 0x8a8   : > { %v5275_v17 = vadd.f32 %v4246_v32, %v1566_v14 }
 0x8a9   : > { %v2072_v41 = vpop.f32.mrf.mxu0 }
 0x8aa   : > { %v5277_v29 = vadd.f32 %v2072_v41, %v1564_v25 }
 0x8ab   : > { %v2182_v21 = vpop.f32.mrf.mxu0 }
 0x8ac   : > { %v2289_v22 = vsel %vm1053_vm3, %v2182_v21, -1e+30 }
 0x8ad   : > { %v4257_v23 = vpop.f32.mrf.mxu0  ;;  %v2295_v30 = vsel %vm1256_vm4, %v2289_v22, -inf }
 0x8ae   : > { %2296 = vmax.xlane.f32.xlu1 %v2295_v30 }
 0x8af   : > { %v2185_v24 = vpop.f32.mrf.mxu0 }
 0x8b1   : > { %v4258_v27 = vpop.f32.mrf.mxu0 }
 0x8b3   : > { %v2282_v28 = vpop.f32.mrf.mxu0 }
 0x8b4   : > { %v2291_v34 = vsel %vm1053_vm3, %v2282_v28, -1e+30 }
 0x8b5   : > { %v4269_v33 = vpop.f32.mrf.mxu0  ;;  %v2301_v35 = vsel %vm1256_vm4, %v2291_v34, -inf }
 0x8b6   : > { %2302 = vmax.xlane.f32.xlu0 %v2301_v35 }
 0x8b7   : > { %v2285_v37 = vpop.f32.mrf.mxu0 }
 0x8b9   : > { %v4270_v38 = vpop.f32.mrf.mxu0 }
 0x8ba   : > { %2317 = vadd.xlane.f32.xlu0 %v2316_v39 }
 0x8be   : > { %2323 = vadd.xlane.f32.xlu0 %v2322_v44  ;;  %v4475_v44 = vld [vmem:[%s4902_s23 + $0x20] sm:$0xff]  }
 0x8bf   : > { %2388 = vrot.lane.b32.xlu1 %v5060_v0, %s4732_s13 }
 0x8c3   : > { %2436 = vrot.lane.b32.xlu1 %v5116_v8, %s4732_s13 }
 0x8d4   : > { %2340 = vrot.lane.b32.xlu0 %v5051_v60, %s4732_s13 }
 0x8d8   : > { %2611 = vrot.lane.b32.xlu0 %v5018_v31, %s4733_s29 }
 0x8dc   : > { %2609 = vrot.lane.b32.xlu0 %v5035_v49, %s4733_s29 }
 0x8e0   : > { %2711 = vrot.lane.b32.xlu0 %v5033_v48, %s4733_s29 }
 0x8e4   : > { %2709 = vrot.lane.b32.xlu0 %v5057_v62, %s4733_s29 }
 0x937   : > { %v2297_v45 = vpop.xlane.xlu1 %2296 }
 0x938   : > { %v2305_v46 = vsub.f32 %v2289_v22, %v2297_v45 }
 0x93a   : > { %v2310_v47 = vmul.f32 1.442695, %v2305_v46 }
 0x93b   : > { %v2389_v50 = vpop.permute.xlu1 %2388 }
 0x93c   : > { %4562 = vpow2.f32 %v2310_v47  ;;  %v2394_v51 = vsel %vm1308_vm2, %v2389_v50, 0 }
 0x93d   : > { %4278 = vmatpush3.bf16.msra.mxu0 %v2394_v51 }
 0x93e   : > { %4289 = vmatprep.subr.bf16.mxu0 %v4729_v15 }
 0x93f   : > { %v2303_v31 = vpop.xlane.xlu0 %2302  ;;  %v2437_v3 = vpop.permute.xlu1 %2436 }
 0x940   : > { %v2307_v52 = vsub.f32 %v2291_v34, %v2303_v31  ;;  %v2442_v7 = vsel %vm1308_vm2, %v2437_v3, 0 }
 0x942   : > { %v2314_v53 = vmul.f32 1.442695, %v2307_v52 }
 0x943   : > { %v2318_v49 = vpop.xlane.xlu0 %2317 }
 0x944   : > { %4564 = vpow2.f32 %v2314_v53 }
 0x945   : > { %4566 = vrcp.f32 %v2318_v49 }
 0x947   : > { %v2324_v48 = vpop.xlane.xlu0 %2323 }
 0x948   : > { %4568 = vrcp.f32 %v2324_v48 }
 0x949   : > { %v4563_v54 = vpop.eup %4562 }
 0x94a   : > { %v2319_v62 = vsel %vm1256_vm4, %v4563_v54, 0.0 }
 0x94b   : > { %2320 = vadd.xlane.f32.xlu1 %v2319_v62  ;;  %v2341_v55 = vpop.permute.xlu0 %2340 }
 0x94c   : > { %v2346_v58 = vsel %vm1308_vm2, %v2341_v55, 0 }
 0x94d   : > { %4272 = vmatpush3.bf16.msra.mxu1 %v2346_v58 }
 0x94e   : > { %4283 = vmatprep.subr.bf16.mxu1 %v4729_v15 }
 0x951   : > { %v4565_v59 = vpop.eup %4564 }
 0x952   : > { %v4567_v61 = vpop.eup %4566  ;;  %v2325_v63 = vsel %vm1256_vm4, %v4565_v59, 0.0 }
 0x953   : > { %2326 = vadd.xlane.f32.xlu1 %v2325_v63  ;;  %v2329_v1 = vmul.f32 %v4567_v61, %v4559_v36 }
 0x955   : > { %v2336_v5 = vpack.c.bf16 %v2329_v1, %v2329_v1  ;;  %v4569_v6 = vpop.eup %4568 }
 0x956   : > { %v2333_v10 = vmul.f32 %v4569_v6, %v4561_v42  ;;  %v4474_v42 = vld [vmem:[%s4902_s23 + $0x28] sm:$0xff]  }
 0x957   : > { %4274 = vmatmul.mubr.msk.bf16.vlgmr.msra.gmra.mxu1 %vm1256_vm4, %v2336_v5 }
 0x958   : > { %4284 = vmatpush3.bf16.msra.mxu1 %v2442_v7  ;;  %4285 = vmatprep.mubr.msk.bf16.mxu1 %vm4730_vm0, %v4729_v15  ;;  %v2338_v11 = vpack.c.bf16 %v2333_v10, %v2333_v10 }
 0x959   : > { %4295 = vmatprep.subr.bf16.mxu1 %v4474_v42 }
 0x95f   : > { %4286 = vmatmul.mubr.msk.bf16.vlgmr.msra.gmra.mxu1 %vm1256_vm4, %v2338_v11 }
 0x960   : > { %4296 = vmatpush3.bf16.msra.mxu1 %v4474_v42 }
 0x961   : > { %4297 = vmatprep.subr.bf16.mxu1 %v4475_v44 }
 0x964   : > { %2484 = vrot.lane.b32.xlu1 %v5120_v12, %s4732_s13  ;;  %4298 = vmatpush3.bf16.msra.mxu1 %v4475_v44  ;;  %s5620_s13 = smov %s5619_s27 }
 0x965   : > { %4309 = vmatprep.subr.bf16.mxu1 %v4729_v15 }
 0x968   : > { %2661 = vrot.lane.b32.xlu1 %v5026_v40, %s4733_s29  ;;  %v2612_v40 = vpop.permute.xlu0 %2611 }
 0x969   : > { %v2617_v23 = vsel %vm1065_vm1, %v2612_v40, 0 }
 0x96c   : > { %2659 = vrot.lane.b32.xlu1 %v5046_v57, %s4733_s29  ;;  %v2610_v22 = vpop.permute.xlu0 %2609 }
 0x970   : > { %2761 = vrot.lane.b32.xlu1 %v5042_v56, %s4733_s29  ;;  %v2712_v30 = vpop.permute.xlu0 %2711 }
 0x971   : > { %v2717_v24 = vsel %vm1065_vm1, %v2712_v30, 0 }
 0x974   : > { %2759 = vrot.lane.b32.xlu1 %v5068_v2, %s4733_s29  ;;  %v2710_v27 = vpop.permute.xlu0 %2709 }
 0x9d4   : > { %v2321_v13 = vpop.xlane.xlu1 %2320 }
 0x9d5   : > { %4570 = vrcp.f32 %v2321_v13 }
 0x9dc   : > { %v2327_v14 = vpop.xlane.xlu1 %2326 }
 0x9dd   : > { %4572 = vrcp.f32 %v2327_v14 }
 0x9e0   : > { %v2485_v18 = vpop.permute.xlu1 %2484 }
 0x9e1   : > { %v2490_v21 = vsel %vm1308_vm2, %v2485_v18, 0 }
 0x9e2   : > { %v4571_v32 = vpop.eup %4570 }
 0x9e3   : > { %v2331_v25 = vmul.f32 %v4571_v32, %v4563_v54 }
 0x9e4   : > { %v2662_v50 = vpop.permute.xlu1 %2661 }
 0x9e5   : > { %v2337_v41 = vpack.c.bf16 %v2331_v25, %v2331_v25  ;;  %v2667_v54 = vsel %vm1065_vm1, %v2662_v50, 0 }
 0x9e7   : > { %4280 = vmatmul.mubr.msk.bf16.vlgmr.msra.gmra.mxu0 %vm1256_vm4, %v2337_v41 }
 0x9e8   : > { %4290 = vmatpush3.bf16.msra.mxu0 %v2490_v21  ;;  %4291 = vmatprep.mubr.msk.bf16.mxu0 %vm4730_vm0, %v4729_v15  ;;  %v2660_v49 = vpop.permute.xlu1 %2659 }
 0x9e9   : > { %4303 = vmatprep.subr.bf16.mxu0 %v4729_v15 }
 0x9ea   : > { %v4573_v56 = vpop.eup %4572 }
 0x9eb   : > { %v2335_v57 = vmul.f32 %v4573_v56, %v4565_v59 }
 0x9ec   : > { %v2762_v58 = vpop.permute.xlu1 %2761 }
 0x9ed   : > { %v2339_v2 = vpack.c.bf16 %v2335_v57, %v2335_v57  ;;  %v2767_v3 = vsel %vm1065_vm1, %v2762_v58, 0 }
 0x9ef   : > { %4292 = vmatmul.mubr.msk.bf16.vlgmr.msra.gmra.mxu0 %vm1256_vm4, %v2339_v2 }
 0x9f0   : > { %4304 = vmatpush3.bf16.xpose.msra.mxu0 %v2617_v23  ;;  %4305 = vmatprep.mubr.msk.bf16.mxu0 %vm4730_vm0, %v4729_v15  ;;  %v2760_v11 = vpop.permute.xlu1 %2759 }
 0x9f1   : > { %4315 = vmatprep.subr.bf16.mxu0 %v4729_v15 }
 0x9f7   : > { %4306 = vmatmul.mubr.msk.bf16.vlgmr.msra.gmra.mxu0 %vm1065_vm1, %v2610_v22 }
 0x9f8   : > { %4316 = vmatpush3.bf16.xpose.msra.mxu0 %v2717_v24  ;;  %4317 = vmatprep.mubr.msk.bf16.mxu0 %vm4730_vm0, %v4729_v15 }
 0x9f9   : > { %4327 = vmatprep.subr.bf16.mxu0 %v4729_v15 }
 0x9ff   : > { %4318 = vmatmul.mubr.msk.bf16.vlgmr.msra.gmra.mxu0 %vm1065_vm1, %v2710_v27 }
 0xa00   : > { %4329 = vmatprep.mubr.msk.bf16.mxu0 %vm4730_vm0, %v4729_v15 }
 0xa17   : > { %v2382_v28 = vpop.f32.mrf.mxu1 }
 0xa19   : > { %v4275_v34 = vpop.f32.mrf.mxu1 }
 0xa1b   : > { %v2385_v33 = vpop.f32.mrf.mxu1 }
 0xa1d   : > { %v4276_v35 = vpop.f32.mrf.mxu1 }
 0xa1f   : > { %v2478_v36 = vpop.f32.mrf.mxu1 }
 0xa21   : > { %v4287_v37 = vpop.f32.mrf.mxu1 }
 0xa23   : > { %v2481_v38 = vpop.f32.mrf.mxu1 }
 0xa25   : > { %v4288_v39 = vpop.f32.mrf.mxu1 }
 0xaa7   : > { %v2430_v45 = vpop.f32.mrf.mxu0 }
 0xaa8   : > { %v2532_v46 = vpack.c.bf16 %v2430_v45, %v2382_v28 }
 0xaa9   : > { %v4281_v47 = vpop.f32.mrf.mxu0 }
 0xaaa   : > { %4299 = vmatprep.mubr.msk.bf16.mxu1 %vm1065_vm1, %v2532_v46 }
 0xaab   : > { %v2433_v51 = vpop.f32.mrf.mxu0 }
 0xaad   : > { %v4282_v31 = vpop.f32.mrf.mxu0 }
 0xaaf   : > { %v2526_v52 = vpop.f32.mrf.mxu0 }
 0xab0   : > { %v2533_v53 = vpack.c.bf16 %v2526_v52, %v2478_v36 }
 0xab1   : > { %v4293_v48 = vpop.f32.mrf.mxu0 }
 0xab2   : > { %4300 = vmatmul.mubr.msk.bf16.vlgmr.msra.gmra.mxu1 %vm1065_vm1, %v2533_v53 }
 0xab3   : > { %4310 = vmatpush3.bf16.xpose.msra.mxu1 %v2667_v54  ;;  %v2529_v62 = vpop.f32.mrf.mxu0  ;;  %4311 = vmatprep.mubr.msk.bf16.mxu1 %vm4730_vm0, %v4729_v15 }
 0xab4   : > { %4321 = vmatprep.subr.bf16.mxu1 %v4729_v15 }
 0xab5   : > { %v4294_v55 = vpop.f32.mrf.mxu0 }
 0xab7   : > { %v2653_v59 = vpop.f32.mrf.mxu0 }
 0xab8   : > { %v2809_v61 = vsel %vm1053_vm3, %v2653_v59, -1e+30 }
 0xab9   : > { %v4307_v63 = vpop.f32.mrf.mxu0  ;;  %v2813_v1 = vsel %vm1256_vm4, %v2809_v61, -inf }
 0xaba   : > { %2814 = vmax.xlane.f32.xlu0 %v2813_v1  ;;  %4312 = vmatmul.mubr.msk.bf16.vlgmr.msra.gmra.mxu1 %vm1065_vm1, %v2660_v49 }
 0xabb   : > { %4322 = vmatpush3.bf16.xpose.msra.mxu1 %v2767_v3  ;;  %v2656_v5 = vpop.f32.mrf.mxu0  ;;  %4323 = vmatprep.mubr.msk.bf16.mxu1 %vm4730_vm0, %v4729_v15 }
 0xabc   : > { %4333 = vmatprep.subr.bf16.mxu1 %v4729_v15 }
 0xabd   : > { %v4308_v6 = vpop.f32.mrf.mxu0 }
 0xabf   : > { %v2753_v7 = vpop.f32.mrf.mxu0 }
 0xac0   : > { %v2811_v10 = vsel %vm1053_vm3, %v2753_v7, -1e+30 }
 0xac1   : > { %v4319_v13 = vpop.f32.mrf.mxu0  ;;  %v2819_v14 = vsel %vm1256_vm4, %v2811_v10, -inf }
 0xac2   : > { %2820 = vmax.xlane.f32.xlu0 %v2819_v14  ;;  %4324 = vmatmul.mubr.msk.bf16.vlgmr.msra.gmra.mxu1 %vm1065_vm1, %v2760_v11 }
 0xac3   : > { %v2756_v32 = vpop.f32.mrf.mxu0  ;;  %4335 = vmatprep.mubr.msk.bf16.mxu1 %vm4730_vm0, %v4729_v15 }
 0xac5   : > { %v4320_v25 = vpop.f32.mrf.mxu0 }
 0xb43   : > { %v2815_v18 = vpop.xlane.xlu0 %2814 }
 0xb44   : > { %v2825_v41 = vsub.f32 %v2809_v61, %v2815_v18 }
 0xb46   : > { %v2829_v57 = vmul.f32 1.442695, %v2825_v41 }
 0xb48   : > { %4574 = vpow2.f32 %v2829_v57 }
 0xb4b   : > { %v2821_v21 = vpop.xlane.xlu0 %2820 }
 0xb4c   : > { %v2827_v2 = vsub.f32 %v2811_v10, %v2821_v21 }
 0xb4e   : > { %v2833_v27 = vmul.f32 1.442695, %v2827_v2 }
 0xb50   : > { %4576 = vpow2.f32 %v2833_v27 }
 0xb72   : > { %v4301_v40 = vpop.f32.mrf.mxu1 }
 0xb73   : > { %v5364_v56 = vadd.f32 %v4301_v40, %v5269_v9 }
 0xb74   : > { %v2590_v22 = vpop.f32.mrf.mxu1 }
 0xb75   : > { %v5367_v23 = vadd.f32 %v2590_v22, %v5272_v16 }
 0xb76   : > { %v4302_v30 = vpop.f32.mrf.mxu1 }
 0xb77   : > { %v5370_v24 = vadd.f32 %v4302_v30, %v5275_v17 }
 0xb78   : > { %v2593_v28 = vpop.f32.mrf.mxu1 }
 0xb79   : > { %v5373_v34 = vadd.f32 %v2593_v28, %v5277_v29  ;;  %v4575_v29 = vpop.eup %4574 }
 0xb7a   : > { %v2703_v33 = vpop.f32.mrf.mxu1  ;;  %v2837_v46 = vsel %vm1256_vm4, %v4575_v29, 0.0  ;;  %v4577_v47 = vpop.eup %4576 }
 0xb7b   : > { %v2810_v9 = vsel %vm1053_vm3, %v2703_v33, -1e+30  ;;  %v2843_v50 = vsel %vm1256_vm4, %v4577_v47, 0.0 }
 0xb7c   : > { %v4313_v35 = vpop.f32.mrf.mxu1  ;;  %v2816_v36 = vsel %vm1256_vm4, %v2810_v9, -inf }
 0xb7d   : > { %2817 = vmax.xlane.f32.xlu1 %v2816_v36  ;;  %v4476_v36 = vld [vmem:[%s4902_s23 + $0x38] sm:$0xff]  }
 0xb7e   : > { %v2706_v16 = vpop.f32.mrf.mxu1 }
 0xb80   : > { %v4314_v37 = vpop.f32.mrf.mxu1 }
 0xb82   : > { %v2803_v38 = vpop.f32.mrf.mxu1 }
 0xb83   : > { %v2812_v17 = vsel %vm1053_vm3, %v2803_v38, -1e+30 }
 0xb84   : > { %v4325_v39 = vpop.f32.mrf.mxu1  ;;  %v2822_v42 = vsel %vm1256_vm4, %v2812_v17, -inf }
 0xb85   : > { %2823 = vmax.xlane.f32.xlu0 %v2822_v42 }
 0xb86   : > { %v2806_v44 = vpop.f32.mrf.mxu1 }
 0xb88   : > { %v4326_v45 = vpop.f32.mrf.mxu1 }
 0xb89   : > { %2838 = vadd.xlane.f32.xlu0 %v2837_v46 }
 0xb8d   : > { %2844 = vadd.xlane.f32.xlu0 %v2843_v50 }
 0xb8e   : > { %2909 = vrot.lane.b32.xlu1 %v5060_v0, %s4733_s29 }
 0xb92   : > { %2957 = vrot.lane.b32.xlu1 %v5116_v8, %s4733_s29 }
 0xba3   : > { %2861 = vrot.lane.b32.xlu0 %v5051_v60, %s4733_s29 }
 0xc06   : > { %v2818_v4 = vpop.xlane.xlu1 %2817 }
 0xc07   : > { %v2826_v51 = vsub.f32 %v2810_v9, %v2818_v4 }
 0xc09   : > { %v2831_v31 = vmul.f32 1.442695, %v2826_v51 }
 0xc0a   : > { %v2910_v52 = vpop.permute.xlu1 %2909 }
 0xc0b   : > { %4578 = vpow2.f32 %v2831_v31  ;;  %v2915_v53 = vsel %vm1308_vm2, %v2910_v52, 0 }
 0xc0c   : > { %4334 = vmatpush3.bf16.msra.mxu1 %v2915_v53 }
 0xc0d   : > { %4345 = vmatprep.subr.bf16.mxu1 %v4729_v15 }
 0xc0e   : > { %v2824_v49 = vpop.xlane.xlu0 %2823  ;;  %v2958_v3 = vpop.permute.xlu1 %2957 }
 0xc0f   : > { %v2828_v48 = vsub.f32 %v2812_v17, %v2824_v49  ;;  %v2963_v7 = vsel %vm1308_vm2, %v2958_v3, 0 }
 0xc11   : > { %v2835_v54 = vmul.f32 1.442695, %v2828_v48  ;;  %v4480_v48 = vld [vmem:[%s4926_s30 + $0x74] ss:$8 sps:$4 sm:$0xff]  }
 0xc12   : > { %v2839_v0 = vpop.xlane.xlu0 %2838 }
 0xc13   : > { %4580 = vpow2.f32 %v2835_v54 }
 0xc14   : > { %4582 = vrcp.f32 %v2839_v0 }
 0xc16   : > { %v2845_v8 = vpop.xlane.xlu0 %2844 }
 0xc17   : > { %4584 = vrcp.f32 %v2845_v8 }
 0xc18   : > { %v4579_v62 = vpop.eup %4578 }
 0xc19   : > { %v2840_v60 = vsel %vm1256_vm4, %v4579_v62, 0.0 }
 0xc1a   : > { %2841 = vadd.xlane.f32.xlu1 %v2840_v60  ;;  %v2862_v55 = vpop.permute.xlu0 %2861 }
 0xc1b   : > { %v2867_v58 = vsel %vm1308_vm2, %v2862_v55, 0 }
 0xc1c   : > { %4328 = vmatpush3.bf16.msra.mxu0 %v2867_v58 }
 0xc1d   : > { %4339 = vmatprep.subr.bf16.mxu0 %v4729_v15 }
 0xc20   : > { %v4581_v59 = vpop.eup %4580 }
 0xc21   : > { %v4583_v61 = vpop.eup %4582  ;;  %v2846_v63 = vsel %vm1256_vm4, %v4581_v59, 0.0 }
 0xc22   : > { %2847 = vadd.xlane.f32.xlu1 %v2846_v63  ;;  %v2850_v1 = vmul.f32 %v4583_v61, %v4575_v29 }
 0xc24   : > { %v2857_v5 = vpack.c.bf16 %v2850_v1, %v2850_v1  ;;  %v4585_v6 = vpop.eup %4584 }
 0xc25   : > { %v2854_v10 = vmul.f32 %v4585_v6, %v4577_v47  ;;  %v4483_v6 = vld [vmem:[%s4926_s30 + $0x64] ss:$8 sps:$4 sm:$0xff]  }
 0xc26   : > { %4330 = vmatmul.mubr.msk.bf16.vlgmr.msra.gmra.mxu0 %vm1256_vm4, %v2857_v5 }
 0xc27   : > { %4340 = vmatpush3.bf16.msra.mxu0 %v2963_v7  ;;  %4341 = vmatprep.mubr.msk.bf16.mxu0 %vm4730_vm0, %v4729_v15  ;;  %v2859_v11 = vpack.c.bf16 %v2854_v10, %v2854_v10  ;;  %v4481_v7 = vld [vmem:[%s4926_s30 + $0x60] ss:$8 sps:$4 sm:$0xff]   ;;  %v4486_v10 = vld [vmem:[%s4926_s30 + $0x54] ss:$8 sps:$4 sm:$0xff]  }
 0xc28   : > { %4351 = vmatprep.subr.bf16.mxu0 %v4476_v36 }
 0xc2e   : > { %4342 = vmatmul.mubr.msk.bf16.vlgmr.msra.gmra.mxu0 %vm1256_vm4, %v2859_v11  ;;  %v4484_v11 = vld [vmem:[%s4926_s30 + $0x50] ss:$8 sps:$4 sm:$0xff]  }
 0xc2f   : > { %4352 = vmatpush3.bf16.msra.mxu0 %v4476_v36 }
 0xc33   : > { %3005 = vrot.lane.b32.xlu1 %v5120_v12, %s4733_s29  ;;  %s4634_s29 = scalar_lea.vmem %s3642_s19, 16 }
 0xc34   : > { %p4635_p1 = scmp.ne.s32.totalorder %s3642_s19, %s4634_s29 }
 0xc36   : > { %p4636_p2 = pnand %p4635_p1, %p4854_p3 }
 0xc38   : > { %p4637_p4 = pneg %p4636_p2 }
 0xca3   : > { %v2842_v13 = vpop.xlane.xlu1 %2841 }
 0xca4   : > { %4586 = vrcp.f32 %v2842_v13  ;;  %v4489_v13 = vld [vmem:[%s4926_s30 + $0x44] ss:$8 sps:$4 sm:$0xff]  }
 0xcab   : > { %v2848_v14 = vpop.xlane.xlu1 %2847 }
 0xcac   : > { %4588 = vrcp.f32 %v2848_v14  ;;  %v4487_v14 = vld [vmem:[%s4926_s30 + $0x40] ss:$8 sps:$4 sm:$0xff]  }
 0xcaf   : > { %v3006_v18 = vpop.permute.xlu1 %3005 }
 0xcb0   : > { %v3011_v21 = vsel %vm1308_vm2, %v3006_v18, 0  ;;  %v4495_v18 = vld [vmem:[%s4926_s30 + $0x24] ss:$8 sps:$4 sm:$0xff]  }
 0xcb1   : > { %v4587_v32 = vpop.eup %4586 }
 0xcb2   : > { %v2852_v25 = vmul.f32 %v4587_v32, %v4579_v62  ;;  %v4492_v32 = vld [vmem:[%s4926_s30 + $0x34] ss:$8 sps:$4 sm:$0xff]  }
 0xcb4   : > { %v2858_v41 = vpack.c.bf16 %v2852_v25, %v2852_v25  ;;  %v4490_v25 = vld [vmem:[%s4926_s30 + $0x30] ss:$8 sps:$4 sm:$0xff]  }
 0xcb6   : > { %4336 = vmatmul.mubr.msk.bf16.vlgmr.msra.gmra.mxu1 %vm1256_vm4, %v2858_v41  ;;  %v4493_v41 = vld [vmem:[%s4926_s30 + $0x20] ss:$8 sps:$4 sm:$0xff]  }
 0xcb7   : > { %4346 = vmatpush3.bf16.msra.mxu1 %v3011_v21  ;;  %4347 = vmatprep.mubr.msk.bf16.mxu1 %vm4730_vm0, %v4729_v15  ;;  %v4477_v15 = vld [vmem:[%s4902_s23 + $0x30] sm:$0xff]   ;;  %s4734_s23 = smov [#allocation3]  }
 0xcb8   : > { %4353 = vmatprep.subr.bf16.mxu0 %v4477_v15  ;;  %3306 = vmatprep.subr.bf16.mxu1 %v4480_v48  ;;  %v4498_v21 = vld [vmem:[%s4926_s30 + $0x14] ss:$8 sps:$4 sm:$0xff]  }
 0xcb9   : > { %v4589_v40 = vpop.eup %4588  ;;  %4354 = vmatpush3.bf16.msra.mxu0 %v4477_v15 }
 0xcba   : > { %v2856_v12 = vmul.f32 %v4589_v40, %v4581_v59  ;;  %v4496_v40 = vld [vmem:[%s4926_s30 + $0x10] ss:$8 sps:$4 sm:$0xff]  }
 0xcbc   : > { %v2860_v57 = vpack.c.bf16 %v2856_v12, %v2856_v12  ;;  %v4501_v12 = vld [vmem:[%s4926_s30 + $0x4] ss:$8 sps:$4 sm:$0xff]  }
 0xcbe   : > { %4348 = vmatmul.mubr.msk.bf16.vlgmr.msra.gmra.mxu1 %vm1256_vm4, %v2860_v57  ;;  %v4499_v57 = vld [vmem:[%s4926_s30] ss:$8 sps:$4 sm:$0xff]  }
 0xcbf   : > { %3338 = vmatprep.mubr.bf16.mxu1 %v4728_v43 }
 0xce6   : > { %v2903_v2 = vpop.f32.mrf.mxu0 }
 0xce8   : > { %v4331_v22 = vpop.f32.mrf.mxu0 }
 0xcea   : > { %v2906_v30 = vpop.f32.mrf.mxu0 }
 0xcec   : > { %v4332_v27 = vpop.f32.mrf.mxu0 }
 0xcee   : > { %v2999_v28 = vpop.f32.mrf.mxu0 }
 0xcf0   : > { %v4343_v33 = vpop.f32.mrf.mxu0 }
 0xcf2   : > { %v3002_v9 = vpop.f32.mrf.mxu0 }
 0xcf4   : > { %v4344_v35 = vpop.f32.mrf.mxu0 }
 0xd76   : > { %v2951_v16 = vpop.f32.mrf.mxu1 }
 0xd77   : > { %v3053_v37 = vpack.c.bf16 %v2951_v16, %v2903_v2 }
 0xd78   : > { %v4337_v38 = vpop.f32.mrf.mxu1 }
 0xd79   : > { %4355 = vmatprep.mubr.msk.bf16.mxu0 %vm1065_vm1, %v3053_v37 }
 0xd7a   : > { %v2954_v17 = vpop.f32.mrf.mxu1 }
 0xd7c   : > { %v4338_v39 = vpop.f32.mrf.mxu1 }
 0xd7d   : > { %v3936_v39 = vld [vmem:[%s5615_s5] ss:$0 sm:$0xff] }
 0xd7e   : > { %v3047_v42 = vpop.f32.mrf.mxu1 }
 0xd7f   : > { %v3054_v29 = vpack.c.bf16 %v3047_v42, %v2999_v28 }
 0xd80   : > { %v4349_v44 = vpop.f32.mrf.mxu1 }
 0xd81   : > { %4356 = vmatmul.mubr.msk.bf16.vlgmr.msra.gmra.mxu0 %vm1065_vm1, %v3054_v29 }
 0xd82   : > { %v3050_v45 = vpop.f32.mrf.mxu1 }
 0xd84   : > { %v4350_v46 = vpop.f32.mrf.mxu1 }
 0xd85   : > { %v3937_v46 = vld [vmem:[%s5616_s16] ss:$0 sm:$0xff] }
 0xe41   : > { %v4357_v47 = vpop.f32.mrf.mxu0 }
 0xe42   : > { %v5417_v52 = vadd.f32 %v4357_v47, %v5364_v56 }
 0xe43   : > { %v3111_v50 = vpop.f32.mrf.mxu0 }
 0xe44   : > { %v5413_v4 = vadd.f32 %v3111_v50, %v5367_v23  ;;  %v4478_v23 = vld [vmem:[%s4926_s30 + $0x70] ss:$8 sps:$4 sm:$0xff]   ;;  %s4638_s30 = sshll.u32 %s4734_s23, 4  ;;  %s4639_s30 = int_to_ptr.vmem [resolvable:$false] %s4638_s30 }
 0xe45   : > { %v4358_v51 = vpop.f32.mrf.mxu0  ;;  %3307 = vmatpush1.bf16.msra.mxu1 %v4478_v23  ;;  %s4640_s5 = scalar_lea.vmem %s4639_s30, 32  ;;  %p4641_p5 = scmp.lt.s32.totalorder %s3642_s19, %s4639_s30 }
 0xe46   : > { %3132 = vadd.xlane.f32.xlu0 %v5413_v4  ;;  %v5425_v49 = vadd.f32 %v4358_v51, %v5370_v24  ;;  %3308 = vmatprep.subr.bf16.mxu1 %v4483_v6  ;;  %v4513_v6 = vld [vmem:[%s4936_s0 + $0x10] sm:$0xff]   ;;  %p4642_p6 = scmp.lt.s32.totalorder %s4640_s5, %s4634_s29 }
 0xe47   : > { %v3114_v31 = vpop.f32.mrf.mxu0 }
 0xe48   : > { %v5420_v53 = vadd.f32 %v3114_v31, %v5373_v34  ;;  %p4643_p7 = por %p4642_p6, %p4641_p5 }
 0xe49   : > { %3309 = vmatpush1.bf16.msra.mxu1 %v4481_v7  ;;  %v4514_v7 = vld [vmem:[%s4936_s0 + $0x48] sm:$0xff]  }
 0xe4a   : > { %3134 = vadd.xlane.f32.xlu1 %v5420_v53  ;;  %3136 = vadd.xlane.f32.xlu0 %v5417_v52  ;;  %p4644_p8 = pnand %p4643_p7, %p4637_p4 }
 0xe4b   : > { %3310 = vmatprep.subr.bf16.mxu1 %v4486_v10  ;;  %v4515_v10 = vld [vmem:[%s4936_s0 + $0x8] sm:$0xff]  }
 0xe4d   : > { %3311 = vmatpush1.bf16.msra.mxu1 %v4484_v11  ;;  %v4516_v11 = vld [vmem:[%s4936_s0 + $0x40] sm:$0xff]  }
 0xe4e   : > { %3138 = vadd.xlane.f32.xlu0 %v5425_v49  ;;  %3312 = vmatprep.subr.bf16.mxu1 %v4489_v13  ;;  %v4517_v13 = vld [vmem:[%s4936_s0] sm:$0xff]  }
 0xe51   : > { %3313 = vmatpush1.bf16.msra.mxu1 %v4487_v14  ;;  %v3214_v14 = vld [vmem:[%s4931_s25] sm:$0x3] }
 0xe52   : > { %3314 = vmatprep.subr.bf16.mxu1 %v4492_v32  ;;  %v3219_v32 = vrot.slane %v3214_v14, %v772_v26 }
 0xe55   : > { %3315 = vmatpush1.bf16.msra.mxu1 %v4490_v25  ;;  %v3223_v25 = vrot.slane %v3214_v14, %v776_v20 }
 0xe56   : > { %3316 = vmatprep.subr.bf16.mxu1 %v4495_v18 }
 0xe59   : > { %3317 = vmatpush1.bf16.msra.mxu1 %v4493_v41 }
 0xe5a   : > { %3318 = vmatprep.subr.bf16.mxu1 %v4498_v21 }
 0xe5d   : > { %3319 = vmatpush1.bf16.msra.mxu1 %v4496_v40 }
 0xe5e   : > { %3320 = vmatprep.subr.bf16.mxu1 %v4501_v12 }
 0xe61   : > { %3321 = vmatpush1.bf16.msra.mxu1 %v4499_v57 }
 0xecf   : > { %v3133_v54 = vpop.xlane.xlu0 %3132 }
 0xed0   : > { %v3140_v0 = vmul.f32 0.0078125, %v3133_v54 }
 0xed2   : > { %v5431_v56 = vsub.f32 %v5413_v4, %v3140_v0 }
 0xed3   : > { %v3135_v34 = vpop.xlane.xlu1 %3134  ;;  %v3137_v8 = vpop.xlane.xlu0 %3136 }
 0xed4   : > { %v3141_v62 = vmul.f32 0.0078125, %v3135_v34  ;;  %v3142_v60 = vmul.f32 0.0078125, %v3137_v8  ;;  %v3148_v24 = vmul.f32 %v5431_v56, %v5431_v56 }
 0xed6   : > { %v3145_v55 = vsub.f32 %v5420_v53, %v3141_v62  ;;  %v5437_v58 = vsub.f32 %v5417_v52, %v3142_v60  ;;  %3152 = vadd.xlane.f32.xlu0 %v3148_v24  ;;  %v4502_v60 = vld [vmem:[%s4936_s0 + $0x78] sm:$0xff]  }
 0xed7   : > { %v3139_v59 = vpop.xlane.xlu0 %3138  ;;  %v4503_v24 = vld [vmem:[%s4936_s0 + $0x38] sm:$0xff]   ;;  %4087 = vmatprep.subr.bf16.mxu0 %v4502_v60 }
 0xed8   : > { %v3143_v61 = vmul.f32 0.0078125, %v3139_v59  ;;  %v3149_v63 = vmul.f32 %v3145_v55, %v3145_v55  ;;  %v3150_v1 = vmul.f32 %v5437_v58, %v5437_v58  ;;  %4088 = vmatpush3.bf16.msra.mxu0 %v4503_v24  ;;  %v4506_v59 = vld [vmem:[%s4936_s0 + $0x68] sm:$0xff]  }
 0xeda   : > { %v3147_v3 = vsub.f32 %v5425_v49, %v3143_v61  ;;  %3154 = vadd.xlane.f32.xlu1 %v3149_v63  ;;  %3156 = vadd.xlane.f32.xlu0 %v3150_v1  ;;  %v4508_v61 = vld [vmem:[%s4936_s0 + $0x60] sm:$0xff]   ;;  %v4510_v1 = vld [vmem:[%s4936_s0 + $0x58] sm:$0xff]  }
 0xedb   : > { %v4509_v63 = vld [vmem:[%s4936_s0 + $0x20] sm:$0xff]  }
 0xedc   : > { %v3151_v5 = vmul.f32 %v3147_v3, %v3147_v3 }
 0xede   : > { %3158 = vadd.xlane.f32.xlu1 %v3151_v5  ;;  %v4512_v5 = vld [vmem:[%s4936_s0 + $0x50] sm:$0xff]  }
 0xf5f   : > { %v3153_v2 = vpop.xlane.xlu0 %3152 }
 0xf60   : > { %v3160_v22 = vmul.f32 0.0078125, %v3153_v2 }
 0xf62   : > { %v3164_v30 = vadd.f32 1e-05, %v3160_v22 }
 0xf63   : > { %v3155_v27 = vpop.xlane.xlu1 %3154  ;;  %v3157_v28 = vpop.xlane.xlu0 %3156 }
 0xf64   : > { %4590 = vrsqrt.f32 %v3164_v30  ;;  %v3161_v33 = vmul.f32 0.0078125, %v3155_v27  ;;  %v3162_v9 = vmul.f32 0.0078125, %v3157_v28 }
 0xf66   : > { %v3165_v35 = vadd.f32 1e-05, %v3161_v33  ;;  %v3166_v36 = vadd.f32 1e-05, %v3162_v9 }
 0xf67   : > { %v3159_v15 = vpop.xlane.xlu1 %3158 }
 0xf68   : > { %4592 = vrsqrt.f32 %v3165_v35  ;;  %v3163_v16 = vmul.f32 0.0078125, %v3159_v15 }
 0xf69   : > { %4594 = vrsqrt.f32 %v3166_v36 }
 0xf6a   : > { %v3167_v37 = vadd.f32 1e-05, %v3163_v16 }
 0xf6c   : > { %4596 = vrsqrt.f32 %v3167_v37 }
 0xf71   : > { %v4591_v38 = vpop.eup %4590 }
 0xf72   : > { %v3172_v17 = vmul.f32 %v4591_v38, %v5431_v56 }
 0xf74   : > { %v3182_v44 = vmul.f32 %v3936_v39, %v3172_v17 }
 0xf75   : > { %v4593_v42 = vpop.eup %4592 }
 0xf76   : > { %v3173_v29 = vmul.f32 %v4593_v42, %v3145_v55  ;;  %v4595_v45 = vpop.eup %4594  ;;  %v3192_v51 = vadd.f32 %v3937_v46, %v3182_v44  ;;  %v4504_v55 = vld [vmem:[%s4936_s0 + $0x70] sm:$0xff]  }
 0xf77   : > { %v3174_v23 = vmul.f32 %v4595_v45, %v5437_v58  ;;  %v4505_v58 = vld [vmem:[%s4936_s0 + $0x30] sm:$0xff]   ;;  %4089 = vmatprep.subr.bf16.mxu0 %v4504_v55 }
 0xf78   : > { %v3183_v47 = vmul.f32 %v3936_v39, %v3173_v29  ;;  %4090 = vmatpush3.bf16.msra.mxu0 %v4505_v58 }
 0xf79   : > { %v4597_v50 = vpop.eup %4596  ;;  %v3184_v56 = vmul.f32 %v3936_v39, %v3174_v23  ;;  %4091 = vmatprep.subr.bf16.mxu0 %v4506_v59 }
 0xf7a   : > { %v3193_v31 = vadd.f32 %v3937_v46, %v3183_v47  ;;  %v3175_v48 = vmul.f32 %v4597_v50, %v3147_v3  ;;  %v4511_v3 = vld [vmem:[%s4936_s0 + $0x18] sm:$0xff]  }
 0xf7b   : > { %v3194_v8 = vadd.f32 %v3937_v46, %v3184_v56 }
 0xf7c   : > { %v3196_v54 = vpack.c.bf16 %v3193_v31, %v3192_v51  ;;  %v3185_v0 = vmul.f32 %v3936_v39, %v3175_v48 }
 0xf7e   : > { %3339 = vmatmul.mubr.bf16.vlgmr.msra.gmra.mxu1 %v3196_v54  ;;  %v3195_v34 = vadd.f32 %v3937_v46, %v3185_v0 }
 0xf7f   : > { %3348 = vmatprep.mubr.bf16.mxu1 %v4728_v43  ;;  %v4507_v43 = vld [vmem:[%s4936_s0 + $0x28] sm:$0xff]  }
 0xf80   : > { %v3197_v62 = vpack.c.bf16 %v3195_v34, %v3194_v8  ;;  %4092 = vmatpush3.bf16.msra.mxu0 %v4507_v43 }
 0xf81   : > { %4093 = vmatprep.subr.bf16.mxu0 %v4508_v61 }
 0xf84   : > { %4094 = vmatpush3.bf16.msra.mxu0 %v4509_v63 }
 0xf85   : > { %4095 = vmatprep.subr.bf16.mxu0 %v4510_v1 }
 0xf86   : > { %3349 = vmatmul.mubr.bf16.gmra.mxu1 %v3197_v62 }
 0xf88   : > { %4096 = vmatpush3.bf16.msra.mxu0 %v4511_v3 }
 0xf89   : > { %4097 = vmatprep.subr.bf16.mxu0 %v4512_v5 }
 0xf8c   : > { %4098 = vmatpush3.bf16.msra.mxu0 %v4513_v6 }
 0xf8d   : > { %4099 = vmatprep.subr.bf16.mxu0 %v4514_v7 }
 0xf90   : > { %4100 = vmatpush3.bf16.msra.mxu0 %v4515_v10 }
 0xf91   : > { %4101 = vmatprep.subr.bf16.mxu0 %v4516_v11 }
 0xf94   : > { %4102 = vmatpush3.bf16.msra.mxu0 %v4517_v13 }
0x103e   : > { %v3340_v18 = vpop.f32.mrf.mxu1 }
0x103f   : > { %v5490_v41 = vadd.f32 %v3340_v18, %v3219_v32 }
0x1040   : > { %v3342_v21 = vpop.f32.mrf.mxu1 }
0x1041   : > { %v3954_v40 = vmul.f32 -1.702, %v5490_v41  ;;  %v5493_v12 = vadd.f32 %v3342_v21, %v3223_v25 }
0x1042   : > { %v3344_v57 = vpop.f32.mrf.mxu1 }
0x1043   : > { %v3375_v2 = vmul.f32 1.442695, %v3954_v40  ;;  %v3955_v22 = vmul.f32 -1.702, %v5493_v12  ;;  %v3345_v30 = vadd.f32 %v3344_v57, %v3219_v32 }
0x1044   : > { %v3346_v27 = vpop.f32.mrf.mxu1 }
0x1045   : > { %v3377_v28 = vmul.f32 1.442695, %v3955_v22  ;;  %v3956_v33 = vmul.f32 -1.702, %v3345_v30  ;;  %v3347_v26 = vadd.f32 %v3346_v27, %v3223_v25  ;;  %4598 = vpow2.f32 %v3375_v2 }
0x1046   : > { %v3350_v19 = vpop.f32.mrf.mxu1 }
0x1047   : > { %4600 = vpow2.f32 %v3377_v28  ;;  %v3379_v20 = vmul.f32 1.442695, %v3956_v33  ;;  %v3957_v9 = vmul.f32 -1.702, %v3347_v26  ;;  %v5496_v35 = vadd.f32 %v3350_v19, %v3219_v32 }
0x1048   : > { %v3352_v36 = vpop.f32.mrf.mxu1 }
0x1049   : > { %4602 = vpow2.f32 %v3379_v20  ;;  %v3381_v15 = vmul.f32 1.442695, %v3957_v9  ;;  %v3958_v16 = vmul.f32 -1.702, %v5496_v35  ;;  %v3353_v37 = vadd.f32 %v3352_v36, %v3223_v25 }
0x104a   : > { %v3354_v38 = vpop.f32.mrf.mxu1 }
0x104b   : > { %4604 = vpow2.f32 %v3381_v15  ;;  %v3383_v17 = vmul.f32 1.442695, %v3958_v16  ;;  %v3959_v39 = vmul.f32 -1.702, %v3353_v37  ;;  %v3355_v42 = vadd.f32 %v3354_v38, %v3219_v32 }
0x104c   : > { %v3356_v29 = vpop.f32.mrf.mxu1 }
0x104d   : > { %v3385_v44 = vmul.f32 1.442695, %v3959_v39  ;;  %v3960_v45 = vmul.f32 -1.702, %v3355_v42  ;;  %v3357_v46 = vadd.f32 %v3356_v29, %v3223_v25  ;;  %4606 = vpow2.f32 %v3383_v17 }
0x104f   : > { %4608 = vpow2.f32 %v3385_v44  ;;  %v3387_v47 = vmul.f32 1.442695, %v3960_v45  ;;  %v3961_v50 = vmul.f32 -1.702, %v3357_v46 }
0x1051   : > { %4610 = vpow2.f32 %v3387_v47  ;;  %v3389_v51 = vmul.f32 1.442695, %v3961_v50 }
0x1052   : > { %v4599_v31 = vpop.eup %4598 }
0x1053   : > { %4612 = vpow2.f32 %v3389_v51  ;;  %v3391_v0 = vadd.f32 1.0, %v4599_v31 }
0x1054   : > { %v4601_v23 = vpop.eup %4600 }
0x1055   : > { %v3392_v48 = vadd.f32 1.0, %v4601_v23 }
0x1056   : > { %v4603_v54 = vpop.eup %4602 }
0x1057   : > { %v3393_v56 = vadd.f32 1.0, %v4603_v54  ;;  %4614 = vrcp.f32 %v3392_v48 }
0x1058   : > { %v4605_v34 = vpop.eup %4604 }
0x1059   : > { %4616 = vrcp.f32 %v3393_v56  ;;  %v3394_v8 = vadd.f32 1.0, %v4605_v34 }
0x105a   : > { %4618 = vrcp.f32 %v3391_v0  ;;  %v4607_v62 = vpop.eup %4606 }
0x105b   : > { %4620 = vrcp.f32 %v3394_v8  ;;  %v3395_v58 = vadd.f32 1.0, %v4607_v62 }
0x105c   : > { %v4609_v60 = vpop.eup %4608 }
0x105d   : > { %v3396_v24 = vadd.f32 1.0, %v4609_v60 }
0x105e   : > { %v4611_v55 = vpop.eup %4610 }
0x105f   : > { %v3397_v59 = vadd.f32 1.0, %v4611_v55  ;;  %4622 = vrcp.f32 %v3396_v24 }
0x1060   : > { %v4613_v43 = vpop.eup %4612 }
0x1061   : > { %4624 = vrcp.f32 %v3397_v59  ;;  %v3398_v61 = vadd.f32 1.0, %v4613_v43 }
0x1062   : > { %4626 = vrcp.f32 %v3395_v58 }
0x1063   : > { %4628 = vrcp.f32 %v3398_v61 }
0x1064   : > { %v4615_v63 = vpop.eup %4614 }
0x1065   : > { %v3416_v7 = vmul.f32 %v4615_v63, %v5493_v12 }
0x1066   : > { %v4617_v1 = vpop.eup %4616 }
0x1067   : > { %v4619_v3 = vpop.eup %4618  ;;  %v3417_v6 = vmul.f32 %v4617_v1, %v3345_v30 }
0x1068   : > { %v4621_v5 = vpop.eup %4620  ;;  %v3415_v11 = vmul.f32 %v4619_v3, %v5490_v41  ;;  %v3962_v41 = vld [vmem:[%s649_s15] ss:$0 sm:$0xff]  ;;  %s3979_s15 = sshll.u32 %s5617_s17, 4 }
0x1069   : > { %v3418_v10 = vmul.f32 %v4621_v5, %v3347_v26  ;;  %s3639_s14 = scalar_lea.hbm %s5619_s27, %s3979_s15 }
0x106a   : > { %v3423_v14 = vpack.c.bf16 %v3417_v6, %v3415_v11 }
0x106b   : > { %v3424_v13 = vpack.c.bf16 %v3418_v10, %v3416_v7 }
0x106c   : > { %v4623_v32 = vpop.eup %4622 }
0x106d   : > { %3594 = vmatprep.mubr.bf16.mxu0 %v3424_v13  ;;  %v3420_v57 = vmul.f32 %v4623_v32, %v3353_v37 }
0x106e   : > { %v4625_v25 = vpop.eup %4624  ;;  %3595 = vmatmul.mubr.bf16.vlgmr.msra.gmra.mxu0 %v3423_v14 }
0x106f   : > { %v4627_v18 = vpop.eup %4626  ;;  %v3421_v40 = vmul.f32 %v4625_v25, %v3355_v42 }
0x1070   : > { %v4629_v21 = vpop.eup %4628  ;;  %v3419_v22 = vmul.f32 %v4627_v18, %v5496_v35 }
0x1071   : > { %v3422_v2 = vmul.f32 %v4629_v21, %v3357_v46 }
0x1072   : > { %v3425_v27 = vpack.c.bf16 %v3421_v40, %v3419_v22 }
0x1073   : > { %v3426_v30 = vpack.c.bf16 %v3422_v2, %v3420_v57 }
0x1075   : > { %3602 = vmatprep.mubr.bf16.mxu0 %v3426_v30 }
0x1076   : > { %3603 = vmatmul.mubr.bf16.gmra.mxu0 %v3425_v27 }
0x112e   : > { %v4103_v12 = vpop.f32.mrf.mxu0 }
0x1130   : > { %v4104_v28 = vpop.f32.mrf.mxu0 }
0x1131   : > { %v4105_v33 = vadd.f32 %v4104_v28, %v4103_v12 }
0x1132   : > { %v4106_v26 = vpop.f32.mrf.mxu0 }
0x1133   : > { %v3597_v19 = vadd.f32 %v4105_v33, %v3962_v41 }
0x1134   : > { %v4107_v20 = vpop.f32.mrf.mxu0 }
0x1135   : > { %v3611_v9 = vadd.f32 %v3597_v19, %v5413_v4  ;;  %v4108_v36 = vadd.f32 %v4107_v20, %v4106_v26 }
0x1136   : > { %v4109_v15 = vpop.f32.mrf.mxu0 }
0x1137   : > { %3615 = vst [vmem:[#allocation2 + $0x10] sm:$0xff] %v3611_v9  ;;  %v3600_v35 = vadd.f32 %v4108_v36, %v3962_v41 }
0x1138   : > { %v4110_v16 = vpop.f32.mrf.mxu0 }
0x1139   : > { %v3612_v37 = vadd.f32 %v3600_v35, %v5420_v53  ;;  %v4111_v38 = vadd.f32 %v4110_v16, %v4109_v15  ;;  %v3620_v53 = vsel %vm3619_vm5, %v3611_v9, -inf }
0x113a   : > { %v4112_v17 = vpop.f32.mrf.mxu0 }
0x113b   : > { %3616 = vst [vmem:[#allocation2] sm:$0xff] %v3612_v37  ;;  %v3605_v39 = vadd.f32 %v4111_v38, %v3962_v41  ;;  %v3621_v45 = vsel %vm3619_vm5, %v3612_v37, -inf }
0x113c   : > { %v4113_v42 = vpop.f32.mrf.mxu0  ;;  %v3624_v51 = vmax.f32 %v3620_v53, %v3621_v45 }
0x113d   : > { %v3613_v29 = vadd.f32 %v3605_v39, %v5417_v52  ;;  %v4114_v44 = vadd.f32 %v4113_v42, %v4112_v17 }
0x113f   : > { %3617 = vst [vmem:[#allocation2 + $0x18] sm:$0xff] %v3613_v29  ;;  %v3608_v4 = vadd.f32 %v4114_v44, %v3962_v41  ;;  %v3622_v47 = vsel %vm3619_vm5, %v3613_v29, -inf }
0x1141   : > { %v3614_v46 = vadd.f32 %v3608_v4, %v5425_v49 }
0x1143   : > { %3618 = vst [vmem:[#allocation2 + $0x8] sm:$0xff] %v3614_v46  ;;  %v3623_v50 = vsel %vm3619_vm5, %v3614_v46, -inf }
0x1144   : > { %v3625_v31 = vmax.f32 %v3622_v47, %v3623_v50 }
0x1146   : > { %v3626_v23 = vmax.f32 %v3624_v51, %v3625_v31 }
0x1148   : > { %3627 = vst [vmem:[%s4944_s28] sm:$0x1] %v3626_v23 }
0x1149   : > { %4647 = shalt.err (!%p4644_p8)
}
0x114a   : > { %s4648_s3 = scalar_lea.hbm %s3639_s14, 16  ;;  %s4652_s16 = scalar_lea.hbm %s5620_s13, 32 }
0x114b   : > { %p4649_p10 = scmp.ne.s32.totalorder %s3639_s14, %s4648_s3  ;;  %p4653_p13 = scmp.lt.s32.totalorder %s3639_s14, %s5620_s13 }
0x114c   : > { %p4654_p0 = scmp.lt.s32.totalorder %s4652_s16, %s4648_s3 }
0x114d   : > { %p4650_p11 = pnand %p4649_p10, %p4854_p3 }
0x114e   : > { %p4655_p1 = por %p4654_p0, %p4653_p13 }
0x114f   : > { %p4651_p12 = pneg %p4650_p11 }
0x1151   : > { %p4656_p2 = pnand %p4655_p1, %p4651_p12 }
0x1153   : > { %4659 = shalt.err (!%p4656_p2)
}
0x1154   : > { %4361 = dma.vmem_to_hbm [thread:$0]  (%p4854_p3), %s3642_s19, 16, %s3639_s14, %s3629_s2  }
0x1155 PF: > { %s5622_s17 = sld [smem:[#allocation12_spill]] }
0x1156   : > { %s5623_s15 = sld [smem:[#allocation6_spill]] }
0x115b   : > { %p4367_p4 = scmp.ge.s32.totalorder %s5622_s17, 2 }
0x115c   : > { %s3653_s22 = sand.u32 1, %s5623_s15  }
0x115d   : > { %p4364_p5 = pnand %p4367_p4, %p4864_p9  ;;  %s3654_s27 = scalar_lea.sflag [#allocation4], %s3653_s22 }
0x115f   : > { %p4365_p6 = pneg %p4364_p5 }
0x1161   : > { %4693 = dma.done.wait (%p4365_p6), %s3654_s27, 16  }
0x1162   : > { %4695 = vsyncadd (%p4365_p6), %s3654_s27, 4294967280  ;;  %s26_s15 = sadd.s32 1, %s5622_s17   ;;  %s5625_s21 = sld [smem:[#allocation7_spill]] }
0x1163   : > { %p23_p7 = scmp.ge.s32.totalorder %s26_s15, 6   ;;  %s5626_s27 = sld [smem:[#allocation17_spill]] }
0x1164   : > { %s5627_s28 = sld [smem:[#allocation10_spill]]  ;;  %s5631_s25 = smov %s4702_s26 }
0x1165   : > { %s5628_s29 = sld [smem:[#allocation11_spill]]  ;;  %25 = sbr.rel (!%p23_p7) target bundleno = 11 (0xb), region = 147 }
0x1166   : > { %s5629_s30 = sld [smem:[#allocation13_spill]] }
0x1167   : > { %s5630_s14 = sld [smem:[#allocation15_spill]] }
0x1168   : > { %s5632_s26 = smov %s5625_s21 }
0x116a   :  { %3658 = vsyncpa [#allocation4], 1 }
0x116b   :  { %3660 = vsyncpa [#allocation4 + $0x1], 1 }

</bundles_post_ra>
